<compile_context>
chip_gen: v6e
topology: v6e:2x2x1
jax: 0.10.0
libtpu: 0.0.40
codegen_flags: <defaults>
</compile_context>

<pallas_src>
import numpy as np
import jax
import jax.numpy as jnp
from jax.experimental import pallas as pl
from jax.experimental.pallas import tpu as pltpu

# ---- small hyper-parameters consistent with the ConvTran module structure ----
BATCH = 2
CHANNEL_SIZE = 8          # Data_shape[0]
SEQ_LEN = 16              # Data_shape[1]
EMB = 32                  # emb_size
EMB4 = EMB * 4            # conv1 output channels (128)
NUM_HEADS = 4
HEAD_DIM = EMB // NUM_HEADS
DIM_FF = 64
NUM_CLASSES = 7
KW = 8                    # conv1 kernel width (kernel_size=[1, 8])
LN_EPS = 1e-5
BN_EPS = 1e-5

CKW = CHANNEL_SIZE * KW   # 64  (im2col width per row, channel-major)
CKW1 = CKW + 1            # 65  (+1 ones column: conv1+BN bias folded into the matmul)
CE4 = CHANNEL_SIZE * EMB4 # 1024 (conv1 output width / conv2 contraction K)
OUT_PAD = 128             # lane-dense classifier output (sliced to NUM_CLASSES outside)
OUT_ROWS = 8              # sublane-tile-aligned per-batch output block

# ---- packed constants slab layout (one DMA instead of ~12 tiny ones) ----------
VEC_ROWS = 32
(R_SHIFT2, R_ATTG, R_ATTB, R_LN1G, R_LN1B,
 R_LN2G, R_LN2B, R_FF1B, R_FF2B, R_BO) = range(10)
R_HM = 10                 # rows 10..13 : per-head lane masks over EMB
R_PE = 16                 # rows 16..31 : tAPE positional encoding (SEQ_LEN rows)


# ----------------------------------------------------------------------------
# In-kernel math helpers
# ----------------------------------------------------------------------------
def _gelu(x):
    # tanh-approximation GELU (tanh lowers to the EUP -> its own VLIW slot).
    # TODO(synk): differs from torch.nn.GELU()'s exact-erf GELU by ~1e-3 abs.
    c = jnp.float32(0.7978845608028654)   # sqrt(2/pi)
    return 0.5 * x * (1.0 + jnp.tanh(c * (x + jnp.float32(0.044715) * x * x * x)))


def _ln(x, g, b):
    mu = jnp.mean(x, axis=-1, keepdims=True)
    var = jnp.mean((x - mu) ** 2, axis=-1, keepdims=True)
    return (x - mu) * jax.lax.rsqrt(var + LN_EPS) * g + b


def _row(vec_ref, r, width):
    # one (1, width) row of the packed constants slab (static slice, lane offset 0)
    return vec_ref[r:r + 1, :width]


# ----------------------------------------------------------------------------
# Single fused kernel (one batch per grid step):
#   conv stack -> tAPE + eRPE attention -> FFN -> GAP -> classifier
# ----------------------------------------------------------------------------
def _convtran_kernel(patches_ref, w1_ref, w2_ref, wqkv_ref, bias_ref,
                     ff1w_ref, ff2w_ref, wo_ref, vec_ref, out_ref):
    f32 = jnp.float32

    # --- embed_layer (Conv2d [1,8] 'same' + BN + GELU): ONE matmul + ONE GELU ---
    # (bias folded via the ones column of the im2col slab / last row of w1)
    p = patches_ref[0]                                                # (T, CKW1)
    h1 = _gelu(jnp.dot(p, w1_ref[...], preferred_element_type=f32))  # (T, C*EMB4)

    # --- embed_layer2 (Conv2d [C,1] 'valid' + BN + GELU): ONE K=1024 matmul -----
    x_src = _gelu(jnp.dot(h1, w2_ref[...], preferred_element_type=f32)
                  + _row(vec_ref, R_SHIFT2, EMB))                      # (T, EMB)

    # --- tAPE positional encoding + Attention_Rel_Scl (eRPE) -------------------
    x_pos = x_src + vec_ref[R_PE:R_PE + SEQ_LEN, :EMB]
    qkv = jnp.dot(x_pos, wqkv_ref[...], preferred_element_type=f32)   # (T, 3*EMB)
    q = qkv[:, 0:EMB]
    k = qkv[:, EMB:2 * EMB]
    v = qkv[:, 2 * EMB:3 * EMB]

    scale = f32(EMB ** -0.5)        # repo uses emb_size**-0.5 (not head_dim**-0.5)
    o = jnp.zeros((SEQ_LEN, EMB), f32)
    for h in range(NUM_HEADS):
        hm = _row(vec_ref, R_HM + h, EMB)                              # (1, EMB) head lane mask
        s = jax.lax.dot_general(q * hm, k, (((1,), (1,)), ((), ())),
                                preferred_element_type=f32) * scale    # (T, T)
        s = s - jnp.max(s, axis=-1, keepdims=True)
        e = jnp.exp(s)
        attn = e / jnp.sum(e, axis=-1, keepdims=True)
        attn = attn + bias_ref[h]    # eRPE bias is added AFTER softmax (as in repo)
        o = o + jnp.dot(attn, v * hm, preferred_element_type=f32)
    o = _ln(o, _row(vec_ref, R_ATTG, EMB), _row(vec_ref, R_ATTB, EMB))  # to_out LayerNorm
    att = x_src + o                  # residual uses x_src (without pos-enc)

    # --- LayerNorm -> FeedForward -> residual -> LayerNorm2 --------------------
    a = _ln(att, _row(vec_ref, R_LN1G, EMB), _row(vec_ref, R_LN1B, EMB))
    f = jnp.dot(a, ff1w_ref[...], preferred_element_type=f32) + _row(vec_ref, R_FF1B, DIM_FF)
    f = jnp.maximum(f, 0.0)          # ReLU (dropout: eval no-op)
    f = jnp.dot(f, ff2w_ref[...], preferred_element_type=f32) + _row(vec_ref, R_FF2B, EMB)
    out = _ln(a + f, _row(vec_ref, R_LN2G, EMB), _row(vec_ref, R_LN2B, EMB))

    # --- GAP over seq + classifier (lane-dense 128-wide, 8-row aligned store) ---
    g = jnp.broadcast_to(jnp.mean(out, axis=0, keepdims=True), (OUT_ROWS, EMB))
    logits = jnp.dot(g, wo_ref[...], preferred_element_type=f32) + _row(vec_ref, R_BO, OUT_PAD)
    out_ref[...] = logits[None]      # (1, OUT_ROWS, OUT_PAD)


def _const_spec(shape):
    zeros = (0,) * len(shape)
    return pl.BlockSpec(shape, lambda b: zeros)


def convtran_fused(patches, w1, w2, wqkv, bias, ff1w, ff2w, wo, vec):
    return pl.pallas_call(
        _convtran_kernel,
        out_shape=jax.ShapeDtypeStruct((BATCH, OUT_ROWS, OUT_PAD), jnp.float32),
        grid=(BATCH,),
        in_specs=[
            pl.BlockSpec((1, SEQ_LEN, CKW1), lambda b: (b, 0, 0)),   # per-batch im2col slab
            _const_spec(w1.shape),                                   # block-diag conv1 (+bias row)
            _const_spec(w2.shape),                                   # flattened conv2
            _const_spec(wqkv.shape),                                 # fused Wq|Wk|Wv
            _const_spec(bias.shape),                                 # eRPE bias (H, T, T)
            _const_spec(ff1w.shape),
            _const_spec(ff2w.shape),
            _const_spec(wo.shape),                                   # classifier, 128-lane padded
            _const_spec(vec.shape),                                  # packed constants slab
        ],
        out_specs=pl.BlockSpec((1, OUT_ROWS, OUT_PAD), lambda b: (b, 0, 0)),
        # batch steps are independent (attention is per-batch) -> megacore sharding on v7x
        compiler_params=pltpu.CompilerParams(dimension_semantics=("parallel",)),
    )(patches, w1, w2, wqkv, bias, ff1w, ff2w, wo, vec)


# ----------------------------------------------------------------------------
# Host-side: positional encoding, relative bias, parameter init / one-time prep
# ----------------------------------------------------------------------------
def make_tape_pe():
    pe = np.zeros((SEQ_LEN, EMB), dtype=np.float32)
    position = np.arange(SEQ_LEN, dtype=np.float32)[:, None]
    div_term = np.exp(np.arange(0, EMB, 2, dtype=np.float32) * (-np.log(10000.0) / EMB))
    pe[:, 0::2] = np.sin((position * div_term) * (EMB / SEQ_LEN))
    pe[:, 1::2] = np.cos((position * div_term) * (EMB / SEQ_LEN))
    return jnp.asarray(pe)


def make_rel_bias(table):
    # table: (2*SEQ_LEN - 1, NUM_HEADS); bias[h, i, j] = table[i - j + SEQ_LEN - 1, h]
    idx = jnp.arange(SEQ_LEN)
    rel_index = idx[:, None] - idx[None, :] + SEQ_LEN - 1
    return jnp.transpose(table[rel_index], (2, 0, 1))                 # (H, T, T)


def init_params(key):
    ks = jax.random.split(key, 32)
    n = lambda k, s, scale=0.1: scale * jax.random.normal(k, s, dtype=jnp.float32)
    p = {}
    # embed_layer: Conv2d(1, EMB4, [1, 8], same) + BatchNorm2d(EMB4) + GELU
    p["conv1_w"] = n(ks[0], (EMB4, KW))
    p["conv1_b"] = n(ks[1], (EMB4,))
    p["bn1_g"] = 1.0 + n(ks[2], (EMB4,))
    p["bn1_b"] = n(ks[3], (EMB4,))
    p["bn1_m"] = n(ks[4], (EMB4,))
    p["bn1_v"] = 0.5 + jax.random.uniform(ks[5], (EMB4,), dtype=jnp.float32)
    # embed_layer2: Conv2d(EMB4, EMB, [CHANNEL_SIZE, 1], valid) + BatchNorm2d(EMB) + GELU
    p["conv2_w"] = n(ks[6], (EMB, EMB4, CHANNEL_SIZE))
    p["conv2_b"] = n(ks[7], (EMB,))
    p["bn2_g"] = 1.0 + n(ks[8], (EMB,))
    p["bn2_b"] = n(ks[9], (EMB,))
    p["bn2_m"] = n(ks[10], (EMB,))
    p["bn2_v"] = 0.5 + jax.random.uniform(ks[11], (EMB,), dtype=jnp.float32)
    # Attention_Rel_Scl (q/k/v have no bias)
    p["wq"] = n(ks[12], (EMB, EMB))
    p["wk"] = n(ks[13], (EMB, EMB))
    p["wv"] = n(ks[14], (EMB, EMB))
    p["rel_table"] = n(ks[15], (2 * SEQ_LEN - 1, NUM_HEADS))
    p["attn_ln_g"] = 1.0 + n(ks[16], (EMB,))
    p["attn_ln_b"] = n(ks[17], (EMB,))
    # block LayerNorms
    p["ln1_g"] = 1.0 + n(ks[18], (EMB,))
    p["ln1_b"] = n(ks[19], (EMB,))
    p["ln2_g"] = 1.0 + n(ks[20], (EMB,))
    p["ln2_b"] = n(ks[21], (EMB,))
    # FeedForward
    p["ff1_w"] = n(ks[22], (DIM_FF, EMB))
    p["ff1_b"] = n(ks[23], (DIM_FF,))
    p["ff2_w"] = n(ks[24], (EMB, DIM_FF))
    p["ff2_b"] = n(ks[25], (EMB,))
    # output Linear
    p["out_w"] = n(ks[26], (NUM_CLASSES, EMB))
    p["out_b"] = n(ks[27], (NUM_CLASSES,))
    return p


def prepare_params(p):
    """One-time weight re-layout (hoisted out of the per-call forward)."""
    # fold BatchNorm (eval) into the conv matmuls
    s1 = p["bn1_g"] / jnp.sqrt(p["bn1_v"] + BN_EPS)
    w1f = p["conv1_w"].T * s1[None, :]                                 # (KW, EMB4)
    shift1 = (p["conv1_b"] - p["bn1_m"]) * s1 + p["bn1_b"]             # (EMB4,)
    # conv1 as ONE matmul: block-diagonal over input channels, bias folded via ones column
    w1 = jnp.concatenate(
        [jnp.kron(jnp.eye(CHANNEL_SIZE, dtype=jnp.float32), w1f),
         jnp.tile(shift1, (CHANNEL_SIZE,))[None, :]], axis=0)          # (CKW+1, C*EMB4)

    s2 = p["bn2_g"] / jnp.sqrt(p["bn2_v"] + BN_EPS)
    # conv2 as ONE K = C*EMB4 matmul: w2[(c, o), e] = conv2_w[e, o, c] * s2[e]
    w2 = (jnp.transpose(p["conv2_w"], (2, 1, 0)) * s2[None, None, :]).reshape(CE4, EMB)
    shift2 = (p["conv2_b"] - p["bn2_m"]) * s2 + p["bn2_b"]

    wqkv = jnp.concatenate([p["wq"].T, p["wk"].T, p["wv"].T], axis=1)  # (EMB, 3*EMB)
    bias = make_rel_bias(p["rel_table"])                               # (H, T, T)
    wo = jnp.zeros((EMB, OUT_PAD), jnp.float32).at[:, :NUM_CLASSES].set(p["out_w"].T)

    # pack every small row vector / mask / pos-enc into ONE (32, 128) slab -> one DMA
    vec = jnp.zeros((VEC_ROWS, 128), jnp.float32)

    def put(v, r, a):
        return v.at[r, :a.shape[0]].set(a)

    vec = put(vec, R_SHIFT2, shift2)
    vec = put(vec, R_ATTG, p["attn_ln_g"]); vec = put(vec, R_ATTB, p["attn_ln_b"])
    vec = put(vec, R_LN1G, p["ln1_g"]);     vec = put(vec, R_LN1B, p["ln1_b"])
    vec = put(vec, R_LN2G, p["ln2_g"]);     vec = put(vec, R_LN2B, p["ln2_b"])
    vec = put(vec, R_FF1B, p["ff1_b"]);     vec = put(vec, R_FF2B, p["ff2_b"])
    vec = put(vec, R_BO, p["out_b"])
    head_id = jnp.arange(EMB) // HEAD_DIM
    for h in range(NUM_HEADS):
        vec = put(vec, R_HM + h, (head_id == h).astype(jnp.float32))
    vec = vec.at[R_PE:R_PE + SEQ_LEN, :EMB].set(make_tape_pe())

    return {"w1": w1, "w2": w2, "wqkv": wqkv, "bias": bias,
            "ff1w": p["ff1_w"].T, "ff2w": p["ff2_w"].T, "wo": wo, "vec": vec}


def forward(prep, x):
    """Per-call work: im2col of the input + ONE fused pallas_call."""
    assert x.shape == (BATCH, CHANNEL_SIZE, SEQ_LEN)
    left = (KW - 1) // 2
    right = KW - 1 - left
    x_pad = jnp.pad(x, ((0, 0), (0, 0), (left, right)))                        # (B, C, T+KW-1)
    win = jnp.stack([x_pad[:, :, k:k + SEQ_LEN] for k in range(KW)], axis=-1)  # (B, C, T, KW)
    patches = jnp.transpose(win, (0, 2, 1, 3)).reshape(BATCH, SEQ_LEN, CKW)    # (B, T, C*KW)
    patches = jnp.concatenate(
        [patches, jnp.ones((BATCH, SEQ_LEN, 1), jnp.float32)], axis=-1)        # ones -> bias row

    out = convtran_fused(patches, prep["w1"], prep["w2"], prep["wqkv"], prep["bias"],
                         prep["ff1w"], prep["ff2w"], prep["wo"], prep["vec"])
    return out[:, 0, :NUM_CLASSES]


if __name__ == "__main__":
    key = jax.random.PRNGKey(0)
    k_param, k_x = jax.random.split(key)
    params = init_params(k_param)
    prep = prepare_params(params)     # one-time: BN folding, block-diag, packing, padding
    x = jax.random.normal(k_x, (BATCH, CHANNEL_SIZE, SEQ_LEN), dtype=jnp.float32)

    logits = jax.jit(forward)(prep, x)
    jax.block_until_ready(logits)
    assert logits.shape == (BATCH, NUM_CLASSES)
    assert bool(jnp.all(jnp.isfinite(logits)))
    print("KERNEL_OK")
</pallas_src>

<mosaic_0001>
module attributes {stable_mosaic.version = 11 : i64} {
  func.func @_convtran_kernel(%arg0: i32, %arg1: memref<1x16x65xf32, #tpu.memory_space<vmem>>, %arg2: memref<65x1024xf32, #tpu.memory_space<vmem>>, %arg3: memref<1024x32xf32, #tpu.memory_space<vmem>>, %arg4: memref<32x96xf32, #tpu.memory_space<vmem>>, %arg5: memref<4x16x16xf32, #tpu.memory_space<vmem>>, %arg6: memref<32x64xf32, #tpu.memory_space<vmem>>, %arg7: memref<64x32xf32, #tpu.memory_space<vmem>>, %arg8: memref<32x128xf32, #tpu.memory_space<vmem>>, %arg9: memref<32x128xf32, #tpu.memory_space<vmem>>, %arg10: memref<1x8x128xf32, #tpu.memory_space<vmem>>) attributes {dimension_semantics = [#tpu.dimension_semantics<parallel>], iteration_bounds = array<i64: 2>, scalar_prefetch = 0 : i64, scratch_operands = 0 : i64, tpu.core_type = #tpu.core_type<tc>, window_params = [{transform_indices = @transform_0, window_bounds = array<i64: 1, 16, 65>}, {pipeline_mode = #tpu.pipeline_mode<synchronous>, transform_indices = @transform_1, window_bounds = array<i64: 65, 1024>}, {pipeline_mode = #tpu.pipeline_mode<synchronous>, transform_indices = @transform_2, window_bounds = array<i64: 1024, 32>}, {pipeline_mode = #tpu.pipeline_mode<synchronous>, transform_indices = @transform_3, window_bounds = array<i64: 32, 96>}, {pipeline_mode = #tpu.pipeline_mode<synchronous>, transform_indices = @transform_4, window_bounds = array<i64: 4, 16, 16>}, {pipeline_mode = #tpu.pipeline_mode<synchronous>, transform_indices = @transform_5, window_bounds = array<i64: 32, 64>}, {pipeline_mode = #tpu.pipeline_mode<synchronous>, transform_indices = @transform_6, window_bounds = array<i64: 64, 32>}, {pipeline_mode = #tpu.pipeline_mode<synchronous>, transform_indices = @transform_7, window_bounds = array<i64: 32, 128>}, {pipeline_mode = #tpu.pipeline_mode<synchronous>, transform_indices = @transform_8, window_bounds = array<i64: 32, 128>}, {transform_indices = @transform_9, window_bounds = array<i64: 1, 8, 128>}]} {
    %c0 = arith.constant 0 : index
    %c0_0 = arith.constant 0 : index
    %c0_1 = arith.constant 0 : index
    %0 = vector.load %arg1[%c0, %c0_0, %c0_1] : memref<1x16x65xf32, #tpu.memory_space<vmem>>, vector<1x16x65xf32>
    %1 = vector.shape_cast %0 : vector<1x16x65xf32> to vector<16x65xf32>
    %c0_2 = arith.constant 0 : index
    %c0_3 = arith.constant 0 : index
    %2 = vector.load %arg2[%c0_2, %c0_3] : memref<65x1024xf32, #tpu.memory_space<vmem>>, vector<65x1024xf32>
    %cst = arith.constant dense<0.000000e+00> : vector<16x1024xf32>
    %3 = tpu.matmul %1, %2, %cst {dimension_numbers = #tpu.dot_dimension_numbers<[1], [0], [0], [1], [0, 0, 1, 1], [], []>} : vector<16x65xf32>, vector<65x1024xf32>, vector<16x1024xf32> -> vector<16x1024xf32>
    %cst_4 = arith.constant 5.000000e-01 : f32
    %4 = vector.broadcast %cst_4 : f32 to vector<16x1024xf32>
    %5 = arith.mulf %4, %3 : vector<16x1024xf32>
    %cst_5 = arith.constant 4.471500e-02 : f32
    %6 = vector.broadcast %cst_5 : f32 to vector<16x1024xf32>
    %7 = arith.mulf %6, %3 : vector<16x1024xf32>
    %8 = arith.mulf %7, %3 : vector<16x1024xf32>
    %9 = arith.mulf %8, %3 : vector<16x1024xf32>
    %10 = arith.addf %3, %9 : vector<16x1024xf32>
    %cst_6 = arith.constant 0.797884583 : f32
    %11 = vector.broadcast %cst_6 : f32 to vector<16x1024xf32>
    %12 = arith.mulf %11, %10 : vector<16x1024xf32>
    %13 = math.tanh %12 : vector<16x1024xf32>
    %cst_7 = arith.constant 1.000000e+00 : f32
    %14 = vector.broadcast %cst_7 : f32 to vector<16x1024xf32>
    %15 = arith.addf %14, %13 : vector<16x1024xf32>
    %16 = arith.mulf %5, %15 : vector<16x1024xf32>
    %c0_8 = arith.constant 0 : index
    %c0_9 = arith.constant 0 : index
    %17 = vector.load %arg3[%c0_8, %c0_9] : memref<1024x32xf32, #tpu.memory_space<vmem>>, vector<1024x32xf32>
    %cst_10 = arith.constant dense<0.000000e+00> : vector<16x32xf32>
    %18 = tpu.matmul %16, %17, %cst_10 {dimension_numbers = #tpu.dot_dimension_numbers<[1], [0], [0], [1], [0, 0, 1, 1], [], []>} : vector<16x1024xf32>, vector<1024x32xf32>, vector<16x32xf32> -> vector<16x32xf32>
    %c0_11 = arith.constant 0 : index
    %c0_12 = arith.constant 0 : index
    %19 = vector.load %arg9[%c0_11, %c0_12] : memref<32x128xf32, #tpu.memory_space<vmem>>, vector<1x32xf32>
    %20 = vector.broadcast %19 : vector<1x32xf32> to vector<16x32xf32>
    %21 = arith.addf %18, %20 : vector<16x32xf32>
    %cst_13 = arith.constant 5.000000e-01 : f32
    %22 = vector.broadcast %cst_13 : f32 to vector<16x32xf32>
    %23 = arith.mulf %22, %21 : vector<16x32xf32>
    %cst_14 = arith.constant 4.471500e-02 : f32
    %24 = vector.broadcast %cst_14 : f32 to vector<16x32xf32>
    %25 = arith.mulf %24, %21 : vector<16x32xf32>
    %26 = arith.mulf %25, %21 : vector<16x32xf32>
    %27 = arith.mulf %26, %21 : vector<16x32xf32>
    %28 = arith.addf %21, %27 : vector<16x32xf32>
    %cst_15 = arith.constant 0.797884583 : f32
    %29 = vector.broadcast %cst_15 : f32 to vector<16x32xf32>
    %30 = arith.mulf %29, %28 : vector<16x32xf32>
    %31 = math.tanh %30 : vector<16x32xf32>
    %cst_16 = arith.constant 1.000000e+00 : f32
    %32 = vector.broadcast %cst_16 : f32 to vector<16x32xf32>
    %33 = arith.addf %32, %31 : vector<16x32xf32>
    %34 = arith.mulf %23, %33 : vector<16x32xf32>
    %c16 = arith.constant 16 : index
    %c0_17 = arith.constant 0 : index
    %35 = vector.load %arg9[%c16, %c0_17] : memref<32x128xf32, #tpu.memory_space<vmem>>, vector<16x32xf32>
    %36 = arith.addf %34, %35 : vector<16x32xf32>
    %c0_18 = arith.constant 0 : index
    %c0_19 = arith.constant 0 : index
    %37 = vector.load %arg4[%c0_18, %c0_19] : memref<32x96xf32, #tpu.memory_space<vmem>>, vector<32x96xf32>
    %cst_20 = arith.constant dense<0.000000e+00> : vector<16x96xf32>
    %38 = tpu.matmul %36, %37, %cst_20 {dimension_numbers = #tpu.dot_dimension_numbers<[1], [0], [0], [1], [0, 0, 1, 1], [], []>} : vector<16x32xf32>, vector<32x96xf32>, vector<16x96xf32> -> vector<16x96xf32>
    %39 = vector.extract_strided_slice %38 {offsets = [0, 0], sizes = [16, 32], strides = [1, 1]} : vector<16x96xf32> to vector<16x32xf32>
    %40 = vector.extract_strided_slice %38 {offsets = [0, 32], sizes = [16, 32], strides = [1, 1]} : vector<16x96xf32> to vector<16x32xf32>
    %41 = vector.extract_strided_slice %38 {offsets = [0, 64], sizes = [16, 32], strides = [1, 1]} : vector<16x96xf32> to vector<16x32xf32>
    %cst_21 = arith.constant 0.000000e+00 : f32
    %42 = vector.broadcast %cst_21 : f32 to vector<16x32xf32>
    %c10 = arith.constant 10 : index
    %c0_22 = arith.constant 0 : index
    %43 = vector.load %arg9[%c10, %c0_22] : memref<32x128xf32, #tpu.memory_space<vmem>>, vector<1x32xf32>
    %44 = vector.broadcast %43 : vector<1x32xf32> to vector<16x32xf32>
    %45 = arith.mulf %39, %44 : vector<16x32xf32>
    %cst_23 = arith.constant dense<0.000000e+00> : vector<16x16xf32>
    %46 = tpu.matmul %45, %40, %cst_23 {dimension_numbers = #tpu.dot_dimension_numbers<[1], [1], [0], [0], [0, 0, 1, 0], [], []>} : vector<16x32xf32>, vector<16x32xf32>, vector<16x16xf32> -> vector<16x16xf32>
    %cst_24 = arith.constant 0.176776692 : f32
    %47 = vector.broadcast %cst_24 : f32 to vector<16x16xf32>
    %48 = arith.mulf %46, %47 : vector<16x16xf32>
    %cst_25 = arith.constant dense<0xFF800000> : vector<16xf32>
    %49 = vector.multi_reduction <maximumf>, %48, %cst_25 [1] : vector<16x16xf32> to vector<16xf32>
    %50 = vector.shape_cast %49 : vector<16xf32> to vector<16x1xf32>
    %51 = vector.broadcast %50 : vector<16x1xf32> to vector<16x16xf32>
    %52 = arith.subf %48, %51 : vector<16x16xf32>
    %53 = math.exp %52 : vector<16x16xf32>
    %cst_26 = arith.constant dense<0.000000e+00> : vector<16xf32>
    %54 = vector.multi_reduction <add>, %53, %cst_26 [1] : vector<16x16xf32> to vector<16xf32>
    %55 = vector.shape_cast %54 : vector<16xf32> to vector<16x1xf32>
    %56 = vector.broadcast %55 : vector<16x1xf32> to vector<16x16xf32>
    %57 = arith.divf %53, %56 : vector<16x16xf32>
    %c0_27 = arith.constant 0 : index
    %c0_28 = arith.constant 0 : index
    %c0_29 = arith.constant 0 : index
    %58 = vector.load %arg5[%c0_27, %c0_28, %c0_29] : memref<4x16x16xf32, #tpu.memory_space<vmem>>, vector<1x16x16xf32>
    %59 = vector.shape_cast %58 : vector<1x16x16xf32> to vector<16x16xf32>
    %60 = arith.addf %57, %59 : vector<16x16xf32>
    %61 = vector.broadcast %43 : vector<1x32xf32> to vector<16x32xf32>
    %62 = arith.mulf %41, %61 : vector<16x32xf32>
    %cst_30 = arith.constant dense<0.000000e+00> : vector<16x32xf32>
    %63 = tpu.matmul %60, %62, %cst_30 {dimension_numbers = #tpu.dot_dimension_numbers<[1], [0], [0], [1], [0, 0, 1, 1], [], []>} : vector<16x16xf32>, vector<16x32xf32>, vector<16x32xf32> -> vector<16x32xf32>
    %64 = arith.addf %42, %63 : vector<16x32xf32>
    %c11 = arith.constant 11 : index
    %c0_31 = arith.constant 0 : index
    %65 = vector.load %arg9[%c11, %c0_31] : memref<32x128xf32, #tpu.memory_space<vmem>>, vector<1x32xf32>
    %66 = vector.broadcast %65 : vector<1x32xf32> to vector<16x32xf32>
    %67 = arith.mulf %39, %66 : vector<16x32xf32>
    %cst_32 = arith.constant dense<0.000000e+00> : vector<16x16xf32>
    %68 = tpu.matmul %67, %40, %cst_32 {dimension_numbers = #tpu.dot_dimension_numbers<[1], [1], [0], [0], [0, 0, 1, 0], [], []>} : vector<16x32xf32>, vector<16x32xf32>, vector<16x16xf32> -> vector<16x16xf32>
    %cst_33 = arith.constant 0.176776692 : f32
    %69 = vector.broadcast %cst_33 : f32 to vector<16x16xf32>
    %70 = arith.mulf %68, %69 : vector<16x16xf32>
    %cst_34 = arith.constant dense<0xFF800000> : vector<16xf32>
    %71 = vector.multi_reduction <maximumf>, %70, %cst_34 [1] : vector<16x16xf32> to vector<16xf32>
    %72 = vector.shape_cast %71 : vector<16xf32> to vector<16x1xf32>
    %73 = vector.broadcast %72 : vector<16x1xf32> to vector<16x16xf32>
    %74 = arith.subf %70, %73 : vector<16x16xf32>
    %75 = math.exp %74 : vector<16x16xf32>
    %cst_35 = arith.constant dense<0.000000e+00> : vector<16xf32>
    %76 = vector.multi_reduction <add>, %75, %cst_35 [1] : vector<16x16xf32> to vector<16xf32>
    %77 = vector.shape_cast %76 : vector<16xf32> to vector<16x1xf32>
    %78 = vector.broadcast %77 : vector<16x1xf32> to vector<16x16xf32>
    %79 = arith.divf %75, %78 : vector<16x16xf32>
    %c1 = arith.constant 1 : index
    %c0_36 = arith.constant 0 : index
    %c0_37 = arith.constant 0 : index
    %80 = vector.load %arg5[%c1, %c0_36, %c0_37] : memref<4x16x16xf32, #tpu.memory_space<vmem>>, vector<1x16x16xf32>
    %81 = vector.shape_cast %80 : vector<1x16x16xf32> to vector<16x16xf32>
    %82 = arith.addf %79, %81 : vector<16x16xf32>
    %83 = vector.broadcast %65 : vector<1x32xf32> to vector<16x32xf32>
    %84 = arith.mulf %41, %83 : vector<16x32xf32>
    %cst_38 = arith.constant dense<0.000000e+00> : vector<16x32xf32>
    %85 = tpu.matmul %82, %84, %cst_38 {dimension_numbers = #tpu.dot_dimension_numbers<[1], [0], [0], [1], [0, 0, 1, 1], [], []>} : vector<16x16xf32>, vector<16x32xf32>, vector<16x32xf32> -> vector<16x32xf32>
    %86 = arith.addf %64, %85 : vector<16x32xf32>
    %c12 = arith.constant 12 : index
    %c0_39 = arith.constant 0 : index
    %87 = vector.load %arg9[%c12, %c0_39] : memref<32x128xf32, #tpu.memory_space<vmem>>, vector<1x32xf32>
    %88 = vector.broadcast %87 : vector<1x32xf32> to vector<16x32xf32>
    %89 = arith.mulf %39, %88 : vector<16x32xf32>
    %cst_40 = arith.constant dense<0.000000e+00> : vector<16x16xf32>
    %90 = tpu.matmul %89, %40, %cst_40 {dimension_numbers = #tpu.dot_dimension_numbers<[1], [1], [0], [0], [0, 0, 1, 0], [], []>} : vector<16x32xf32>, vector<16x32xf32>, vector<16x16xf32> -> vector<16x16xf32>
    %cst_41 = arith.constant 0.176776692 : f32
    %91 = vector.broadcast %cst_41 : f32 to vector<16x16xf32>
    %92 = arith.mulf %90, %91 : vector<16x16xf32>
    %cst_42 = arith.constant dense<0xFF800000> : vector<16xf32>
    %93 = vector.multi_reduction <maximumf>, %92, %cst_42 [1] : vector<16x16xf32> to vector<16xf32>
    %94 = vector.shape_cast %93 : vector<16xf32> to vector<16x1xf32>
    %95 = vector.broadcast %94 : vector<16x1xf32> to vector<16x16xf32>
    %96 = arith.subf %92, %95 : vector<16x16xf32>
    %97 = math.exp %96 : vector<16x16xf32>
    %cst_43 = arith.constant dense<0.000000e+00> : vector<16xf32>
    %98 = vector.multi_reduction <add>, %97, %cst_43 [1] : vector<16x16xf32> to vector<16xf32>
    %99 = vector.shape_cast %98 : vector<16xf32> to vector<16x1xf32>
    %100 = vector.broadcast %99 : vector<16x1xf32> to vector<16x16xf32>
    %101 = arith.divf %97, %100 : vector<16x16xf32>
    %c2 = arith.constant 2 : index
    %c0_44 = arith.constant 0 : index
    %c0_45 = arith.constant 0 : index
    %102 = vector.load %arg5[%c2, %c0_44, %c0_45] : memref<4x16x16xf32, #tpu.memory_space<vmem>>, vector<1x16x16xf32>
    %103 = vector.shape_cast %102 : vector<1x16x16xf32> to vector<16x16xf32>
    %104 = arith.addf %101, %103 : vector<16x16xf32>
    %105 = vector.broadcast %87 : vector<1x32xf32> to vector<16x32xf32>
    %106 = arith.mulf %41, %105 : vector<16x32xf32>
    %cst_46 = arith.constant dense<0.000000e+00> : vector<16x32xf32>
    %107 = tpu.matmul %104, %106, %cst_46 {dimension_numbers = #tpu.dot_dimension_numbers<[1], [0], [0], [1], [0, 0, 1, 1], [], []>} : vector<16x16xf32>, vector<16x32xf32>, vector<16x32xf32> -> vector<16x32xf32>
    %108 = arith.addf %86, %107 : vector<16x32xf32>
    %c13 = arith.constant 13 : index
    %c0_47 = arith.constant 0 : index
    %109 = vector.load %arg9[%c13, %c0_47] : memref<32x128xf32, #tpu.memory_space<vmem>>, vector<1x32xf32>
    %110 = vector.broadcast %109 : vector<1x32xf32> to vector<16x32xf32>
    %111 = arith.mulf %39, %110 : vector<16x32xf32>
    %cst_48 = arith.constant dense<0.000000e+00> : vector<16x16xf32>
    %112 = tpu.matmul %111, %40, %cst_48 {dimension_numbers = #tpu.dot_dimension_numbers<[1], [1], [0], [0], [0, 0, 1, 0], [], []>} : vector<16x32xf32>, vector<16x32xf32>, vector<16x16xf32> -> vector<16x16xf32>
    %cst_49 = arith.constant 0.176776692 : f32
    %113 = vector.broadcast %cst_49 : f32 to vector<16x16xf32>
    %114 = arith.mulf %112, %113 : vector<16x16xf32>
    %cst_50 = arith.constant dense<0xFF800000> : vector<16xf32>
    %115 = vector.multi_reduction <maximumf>, %114, %cst_50 [1] : vector<16x16xf32> to vector<16xf32>
    %116 = vector.shape_cast %115 : vector<16xf32> to vector<16x1xf32>
    %117 = vector.broadcast %116 : vector<16x1xf32> to vector<16x16xf32>
    %118 = arith.subf %114, %117 : vector<16x16xf32>
    %119 = math.exp %118 : vector<16x16xf32>
    %cst_51 = arith.constant dense<0.000000e+00> : vector<16xf32>
    %120 = vector.multi_reduction <add>, %119, %cst_51 [1] : vector<16x16xf32> to vector<16xf32>
    %121 = vector.shape_cast %120 : vector<16xf32> to vector<16x1xf32>
    %122 = vector.broadcast %121 : vector<16x1xf32> to vector<16x16xf32>
    %123 = arith.divf %119, %122 : vector<16x16xf32>
    %c3 = arith.constant 3 : index
    %c0_52 = arith.constant 0 : index
    %c0_53 = arith.constant 0 : index
    %124 = vector.load %arg5[%c3, %c0_52, %c0_53] : memref<4x16x16xf32, #tpu.memory_space<vmem>>, vector<1x16x16xf32>
    %125 = vector.shape_cast %124 : vector<1x16x16xf32> to vector<16x16xf32>
    %126 = arith.addf %123, %125 : vector<16x16xf32>
    %127 = vector.broadcast %109 : vector<1x32xf32> to vector<16x32xf32>
    %128 = arith.mulf %41, %127 : vector<16x32xf32>
    %cst_54 = arith.constant dense<0.000000e+00> : vector<16x32xf32>
    %129 = tpu.matmul %126, %128, %cst_54 {dimension_numbers = #tpu.dot_dimension_numbers<[1], [0], [0], [1], [0, 0, 1, 1], [], []>} : vector<16x16xf32>, vector<16x32xf32>, vector<16x32xf32> -> vector<16x32xf32>
    %130 = arith.addf %108, %129 : vector<16x32xf32>
    %c1_55 = arith.constant 1 : index
    %c0_56 = arith.constant 0 : index
    %131 = vector.load %arg9[%c1_55, %c0_56] : memref<32x128xf32, #tpu.memory_space<vmem>>, vector<1x32xf32>
    %c2_57 = arith.constant 2 : index
    %c0_58 = arith.constant 0 : index
    %132 = vector.load %arg9[%c2_57, %c0_58] : memref<32x128xf32, #tpu.memory_space<vmem>>, vector<1x32xf32>
    %cst_59 = arith.constant dense<0.000000e+00> : vector<16xf32>
    %133 = vector.multi_reduction <add>, %130, %cst_59 [1] : vector<16x32xf32> to vector<16xf32>
    %134 = vector.shape_cast %133 : vector<16xf32> to vector<16x1xf32>
    %cst_60 = arith.constant 3.200000e+01 : f32
    %135 = vector.broadcast %cst_60 : f32 to vector<16x1xf32>
    %136 = arith.divf %134, %135 : vector<16x1xf32>
    %137 = vector.broadcast %136 : vector<16x1xf32> to vector<16x32xf32>
    %138 = arith.subf %130, %137 : vector<16x32xf32>
    %139 = arith.mulf %138, %138 : vector<16x32xf32>
    %cst_61 = arith.constant dense<0.000000e+00> : vector<16xf32>
    %140 = vector.multi_reduction <add>, %139, %cst_61 [1] : vector<16x32xf32> to vector<16xf32>
    %141 = vector.shape_cast %140 : vector<16xf32> to vector<16x1xf32>
    %cst_62 = arith.constant 3.200000e+01 : f32
    %142 = vector.broadcast %cst_62 : f32 to vector<16x1xf32>
    %143 = arith.divf %141, %142 : vector<16x1xf32>
    %144 = vector.broadcast %136 : vector<16x1xf32> to vector<16x32xf32>
    %145 = arith.subf %130, %144 : vector<16x32xf32>
    %cst_63 = arith.constant 9.99999974E-6 : f32
    %146 = vector.broadcast %cst_63 : f32 to vector<16x1xf32>
    %147 = arith.addf %143, %146 : vector<16x1xf32>
    %148 = math.rsqrt %147 : vector<16x1xf32>
    %149 = vector.broadcast %148 : vector<16x1xf32> to vector<16x32xf32>
    %150 = arith.mulf %145, %149 : vector<16x32xf32>
    %151 = vector.broadcast %131 : vector<1x32xf32> to vector<16x32xf32>
    %152 = arith.mulf %150, %151 : vector<16x32xf32>
    %153 = vector.broadcast %132 : vector<1x32xf32> to vector<16x32xf32>
    %154 = arith.addf %152, %153 : vector<16x32xf32>
    %155 = arith.addf %34, %154 : vector<16x32xf32>
    %c3_64 = arith.constant 3 : index
    %c0_65 = arith.constant 0 : index
    %156 = vector.load %arg9[%c3_64, %c0_65] : memref<32x128xf32, #tpu.memory_space<vmem>>, vector<1x32xf32>
    %c4 = arith.constant 4 : index
    %c0_66 = arith.constant 0 : index
    %157 = vector.load %arg9[%c4, %c0_66] : memref<32x128xf32, #tpu.memory_space<vmem>>, vector<1x32xf32>
    %cst_67 = arith.constant dense<0.000000e+00> : vector<16xf32>
    %158 = vector.multi_reduction <add>, %155, %cst_67 [1] : vector<16x32xf32> to vector<16xf32>
    %159 = vector.shape_cast %158 : vector<16xf32> to vector<16x1xf32>
    %cst_68 = arith.constant 3.200000e+01 : f32
    %160 = vector.broadcast %cst_68 : f32 to vector<16x1xf32>
    %161 = arith.divf %159, %160 : vector<16x1xf32>
    %162 = vector.broadcast %161 : vector<16x1xf32> to vector<16x32xf32>
    %163 = arith.subf %155, %162 : vector<16x32xf32>
    %164 = arith.mulf %163, %163 : vector<16x32xf32>
    %cst_69 = arith.constant dense<0.000000e+00> : vector<16xf32>
    %165 = vector.multi_reduction <add>, %164, %cst_69 [1] : vector<16x32xf32> to vector<16xf32>
    %166 = vector.shape_cast %165 : vector<16xf32> to vector<16x1xf32>
    %cst_70 = arith.constant 3.200000e+01 : f32
    %167 = vector.broadcast %cst_70 : f32 to vector<16x1xf32>
    %168 = arith.divf %166, %167 : vector<16x1xf32>
    %169 = vector.broadcast %161 : vector<16x1xf32> to vector<16x32xf32>
    %170 = arith.subf %155, %169 : vector<16x32xf32>
    %cst_71 = arith.constant 9.99999974E-6 : f32
    %171 = vector.broadcast %cst_71 : f32 to vector<16x1xf32>
    %172 = arith.addf %168, %171 : vector<16x1xf32>
    %173 = math.rsqrt %172 : vector<16x1xf32>
    %174 = vector.broadcast %173 : vector<16x1xf32> to vector<16x32xf32>
    %175 = arith.mulf %170, %174 : vector<16x32xf32>
    %176 = vector.broadcast %156 : vector<1x32xf32> to vector<16x32xf32>
    %177 = arith.mulf %175, %176 : vector<16x32xf32>
    %178 = vector.broadcast %157 : vector<1x32xf32> to vector<16x32xf32>
    %179 = arith.addf %177, %178 : vector<16x32xf32>
    %c0_72 = arith.constant 0 : index
    %c0_73 = arith.constant 0 : index
    %180 = vector.load %arg6[%c0_72, %c0_73] : memref<32x64xf32, #tpu.memory_space<vmem>>, vector<32x64xf32>
    %cst_74 = arith.constant dense<0.000000e+00> : vector<16x64xf32>
    %181 = tpu.matmul %179, %180, %cst_74 {dimension_numbers = #tpu.dot_dimension_numbers<[1], [0], [0], [1], [0, 0, 1, 1], [], []>} : vector<16x32xf32>, vector<32x64xf32>, vector<16x64xf32> -> vector<16x64xf32>
    %c7 = arith.constant 7 : index
    %c0_75 = arith.constant 0 : index
    %182 = vector.load %arg9[%c7, %c0_75] : memref<32x128xf32, #tpu.memory_space<vmem>>, vector<1x64xf32>
    %183 = vector.broadcast %182 : vector<1x64xf32> to vector<16x64xf32>
    %184 = arith.addf %181, %183 : vector<16x64xf32>
    %cst_76 = arith.constant 0.000000e+00 : f32
    %185 = vector.broadcast %cst_76 : f32 to vector<16x64xf32>
    %186 = arith.maximumf %184, %185 : vector<16x64xf32>
    %c0_77 = arith.constant 0 : index
    %c0_78 = arith.constant 0 : index
    %187 = vector.load %arg7[%c0_77, %c0_78] : memref<64x32xf32, #tpu.memory_space<vmem>>, vector<64x32xf32>
    %cst_79 = arith.constant dense<0.000000e+00> : vector<16x32xf32>
    %188 = tpu.matmul %186, %187, %cst_79 {dimension_numbers = #tpu.dot_dimension_numbers<[1], [0], [0], [1], [0, 0, 1, 1], [], []>} : vector<16x64xf32>, vector<64x32xf32>, vector<16x32xf32> -> vector<16x32xf32>
    %c8 = arith.constant 8 : index
    %c0_80 = arith.constant 0 : index
    %189 = vector.load %arg9[%c8, %c0_80] : memref<32x128xf32, #tpu.memory_space<vmem>>, vector<1x32xf32>
    %190 = vector.broadcast %189 : vector<1x32xf32> to vector<16x32xf32>
    %191 = arith.addf %188, %190 : vector<16x32xf32>
    %192 = arith.addf %179, %191 : vector<16x32xf32>
    %c5 = arith.constant 5 : index
    %c0_81 = arith.constant 0 : index
    %193 = vector.load %arg9[%c5, %c0_81] : memref<32x128xf32, #tpu.memory_space<vmem>>, vector<1x32xf32>
    %c6 = arith.constant 6 : index
    %c0_82 = arith.constant 0 : index
    %194 = vector.load %arg9[%c6, %c0_82] : memref<32x128xf32, #tpu.memory_space<vmem>>, vector<1x32xf32>
    %cst_83 = arith.constant dense<0.000000e+00> : vector<16xf32>
    %195 = vector.multi_reduction <add>, %192, %cst_83 [1] : vector<16x32xf32> to vector<16xf32>
    %196 = vector.shape_cast %195 : vector<16xf32> to vector<16x1xf32>
    %cst_84 = arith.constant 3.200000e+01 : f32
    %197 = vector.broadcast %cst_84 : f32 to vector<16x1xf32>
    %198 = arith.divf %196, %197 : vector<16x1xf32>
    %199 = vector.broadcast %198 : vector<16x1xf32> to vector<16x32xf32>
    %200 = arith.subf %192, %199 : vector<16x32xf32>
    %201 = arith.mulf %200, %200 : vector<16x32xf32>
    %cst_85 = arith.constant dense<0.000000e+00> : vector<16xf32>
    %202 = vector.multi_reduction <add>, %201, %cst_85 [1] : vector<16x32xf32> to vector<16xf32>
    %203 = vector.shape_cast %202 : vector<16xf32> to vector<16x1xf32>
    %cst_86 = arith.constant 3.200000e+01 : f32
    %204 = vector.broadcast %cst_86 : f32 to vector<16x1xf32>
    %205 = arith.divf %203, %204 : vector<16x1xf32>
    %206 = vector.broadcast %198 : vector<16x1xf32> to vector<16x32xf32>
    %207 = arith.subf %192, %206 : vector<16x32xf32>
    %cst_87 = arith.constant 9.99999974E-6 : f32
    %208 = vector.broadcast %cst_87 : f32 to vector<16x1xf32>
    %209 = arith.addf %205, %208 : vector<16x1xf32>
    %210 = math.rsqrt %209 : vector<16x1xf32>
    %211 = vector.broadcast %210 : vector<16x1xf32> to vector<16x32xf32>
    %212 = arith.mulf %207, %211 : vector<16x32xf32>
    %213 = vector.broadcast %193 : vector<1x32xf32> to vector<16x32xf32>
    %214 = arith.mulf %212, %213 : vector<16x32xf32>
    %215 = vector.broadcast %194 : vector<1x32xf32> to vector<16x32xf32>
    %216 = arith.addf %214, %215 : vector<16x32xf32>
    %cst_88 = arith.constant dense<0.000000e+00> : vector<32xf32>
    %217 = vector.multi_reduction <add>, %216, %cst_88 [0] : vector<16x32xf32> to vector<32xf32>
    %218 = vector.shape_cast %217 : vector<32xf32> to vector<1x32xf32>
    %cst_89 = arith.constant 1.600000e+01 : f32
    %219 = vector.broadcast %cst_89 : f32 to vector<1x32xf32>
    %220 = arith.divf %218, %219 : vector<1x32xf32>
    %221 = vector.shape_cast %220 : vector<1x32xf32> to vector<1x32xf32>
    %222 = vector.broadcast %221 : vector<1x32xf32> to vector<8x32xf32>
    %c0_90 = arith.constant 0 : index
    %c0_91 = arith.constant 0 : index
    %223 = vector.load %arg8[%c0_90, %c0_91] : memref<32x128xf32, #tpu.memory_space<vmem>>, vector<32x128xf32>
    %cst_92 = arith.constant dense<0.000000e+00> : vector<8x128xf32>
    %224 = tpu.matmul %222, %223, %cst_92 {dimension_numbers = #tpu.dot_dimension_numbers<[1], [0], [0], [1], [0, 0, 1, 1], [], []>} : vector<8x32xf32>, vector<32x128xf32>, vector<8x128xf32> -> vector<8x128xf32>
    %c9 = arith.constant 9 : index
    %c0_93 = arith.constant 0 : index
    %225 = vector.load %arg9[%c9, %c0_93] : memref<32x128xf32, #tpu.memory_space<vmem>>, vector<1x128xf32>
    %226 = vector.broadcast %225 : vector<1x128xf32> to vector<8x128xf32>
    %227 = arith.addf %224, %226 : vector<8x128xf32>
    %228 = vector.shape_cast %227 : vector<8x128xf32> to vector<1x8x128xf32>
    %c0_94 = arith.constant 0 : index
    %c0_95 = arith.constant 0 : index
    %c0_96 = arith.constant 0 : index
    %229 = vector.load %arg10[%c0_94, %c0_95, %c0_96] : memref<1x8x128xf32, #tpu.memory_space<vmem>>, vector<1x8x128xf32>
    tpu.vector_store %arg10[%c0_94, %c0_95, %c0_96], %228 {strides = array<i32>} : memref<1x8x128xf32, #tpu.memory_space<vmem>>, vector<1x8x128xf32>,
    return
  }
  func.func @transform_0(%arg0: i32) -> (i32, i32, i32) {
    %c0_i32 = arith.constant 0 : i32
    %c0_i32_0 = arith.constant 0 : i32
    %c0_i32_1 = arith.constant 0 : i32
    return %arg0, %c0_i32, %c0_i32_0 : i32, i32, i32
  }
  func.func @transform_1(%arg0: i32) -> (i32, i32) {
    %c0_i32 = arith.constant 0 : i32
    %c0_i32_0 = arith.constant 0 : i32
    %c0_i32_1 = arith.constant 0 : i32
    return %c0_i32, %c0_i32_0 : i32, i32
  }
  func.func @transform_2(%arg0: i32) -> (i32, i32) {
    %c0_i32 = arith.constant 0 : i32
    %c0_i32_0 = arith.constant 0 : i32
    %c0_i32_1 = arith.constant 0 : i32
    return %c0_i32, %c0_i32_0 : i32, i32
  }
  func.func @transform_3(%arg0: i32) -> (i32, i32) {
    %c0_i32 = arith.constant 0 : i32
    %c0_i32_0 = arith.constant 0 : i32
    %c0_i32_1 = arith.constant 0 : i32
    return %c0_i32, %c0_i32_0 : i32, i32
  }
  func.func @transform_4(%arg0: i32) -> (i32, i32, i32) {
    %c0_i32 = arith.constant 0 : i32
    %c0_i32_0 = arith.constant 0 : i32
    %c0_i32_1 = arith.constant 0 : i32
    %c0_i32_2 = arith.constant 0 : i32
    return %c0_i32, %c0_i32_0, %c0_i32_1 : i32, i32, i32
  }
  func.func @transform_5(%arg0: i32) -> (i32, i32) {
    %c0_i32 = arith.constant 0 : i32
    %c0_i32_0 = arith.constant 0 : i32
    %c0_i32_1 = arith.constant 0 : i32
    return %c0_i32, %c0_i32_0 : i32, i32
  }
  func.func @transform_6(%arg0: i32) -> (i32, i32) {
    %c0_i32 = arith.constant 0 : i32
    %c0_i32_0 = arith.constant 0 : i32
    %c0_i32_1 = arith.constant 0 : i32
    return %c0_i32, %c0_i32_0 : i32, i32
  }
  func.func @transform_7(%arg0: i32) -> (i32, i32) {
    %c0_i32 = arith.constant 0 : i32
    %c0_i32_0 = arith.constant 0 : i32
    %c0_i32_1 = arith.constant 0 : i32
    return %c0_i32, %c0_i32_0 : i32, i32
  }
  func.func @transform_8(%arg0: i32) -> (i32, i32) {
    %c0_i32 = arith.constant 0 : i32
    %c0_i32_0 = arith.constant 0 : i32
    %c0_i32_1 = arith.constant 0 : i32
    return %c0_i32, %c0_i32_0 : i32, i32
  }
  func.func @transform_9(%arg0: i32) -> (i32, i32, i32) {
    %c0_i32 = arith.constant 0 : i32
    %c0_i32_0 = arith.constant 0 : i32
    %c0_i32_1 = arith.constant 0 : i32
    return %arg0, %c0_i32, %c0_i32_0 : i32, i32, i32
  }
}

</mosaic_0001>

<bundles_post_ra>
// kernel: forward.1
= control target key start
LH: loop header
LB: loop body
LE: loop exit
PB: predicated region body
PF: predicated region fallthrough
CT: control target
= control target key end

     0   :  { %s3302_s30 = smov 0   ;;  %s4362_s0 = inlined_call_operand.vmem [shape: f32[2,16,65], index: 0, kind: input, shape index: {}]   ;;  %s4363_s1 = inlined_call_operand.vmem [shape: f32[65,1024], index: 1, kind: input, shape index: {}]   ;;  %s4364_s2 = inlined_call_operand.vmem [shape: f32[1024,32], index: 2, kind: input, shape index: {}]   ;;  %s4365_s3 = inlined_call_operand.vmem [shape: f32[32,96], index: 3, kind: input, shape index: {}]   ;;  %s4366_s4 = inlined_call_operand.vmem [shape: f32[4,16,16], index: 4, kind: input, shape index: {}]   ;;  %s4367_s5 = inlined_call_operand.vmem [shape: f32[32,64], index: 5, kind: input, shape index: {}]   ;;  %s4368_s6 = inlined_call_operand.vmem [shape: f32[64,32], index: 6, kind: input, shape index: {}]   ;;  %s4369_s7 = inlined_call_operand.vmem [shape: f32[32,128], index: 7, kind: input, shape index: {}]   ;;  %s4370_s8 = inlined_call_operand.vmem [shape: f32[32,128], index: 8, kind: input, shape index: {}]   ;;  %s4371_s9 = inlined_call_operand.vmem [shape: f32[2,8,128], index: 9, kind: output, shape index: {}]  }
   0x1 LB: > { %s2751_s10 = sadd.s32 4294967295, %s3246_s30   ;;  %p2755_p0 = scmp.ge.s32.totalorder %s3246_s30, 1  ;;  %s3246_s30 = sphi %s3302_s30, %s19_s30  }
   0x2   : > { %p287_p1 = scmp.lt.s32.totalorder %s3246_s30, 3 }
   0x4   : > { %p288_p2 = pnand %p2755_p0, %p287_p1 }
   0x5   : > { %p3352_p3 = scmp.lt.s32.totalorder (!%p288_p2), %s2751_s10, 1  ;;  %s3249_s13 = smov (!%p288_p2), 96  }
   0x6   : > { %291 = sbr.rel (%p288_p2) target bundleno = 3673 (0xe59), region = 56  ;;  %s3250_s20 = smov (!%p288_p2), 64  }
   0xb   : > { %v398_v0 = vld [vmem:[%s4363_s1 + $0x208] sm:$0x1]  ;;  %vm412_vm0 = vcmask 1040384   ;;  %v400_v1 = vld [vmem:[%s4363_s1 + $0x218] sm:$0x1]  ;;  %v389_v6 = vld [vmem:[%s4363_s1 + $0x1c0] sm:$0xff] }
   0xc   : > { %v390_v2 = vld [vmem:[%s4363_s1 + $0x1c8] sm:$0xff]  ;;  %2759 = vmatprep.subr.msk.mxu0 %vm412_vm0, %v398_v0  ;;  %2763 = vmatprep.subr.msk.mxu1 %vm412_vm0, %v400_v1  ;;  %v397_v3 = vld [vmem:[%s4363_s1 + $0x200] sm:$0x1]  ;;  %v399_v4 = vld [vmem:[%s4363_s1 + $0x210] sm:$0x1]  ;;  %s4374_s10 = smov (!%p3352_p3, %s2751_s10), 1 }
   0xd   : > { %v392_v5 = vld [vmem:[%s4363_s1 + $0x1d8] sm:$0xff]  ;;  %2760 = vmatpush1.msk.msra.mxu0 %vm412_vm0, %v397_v3  ;;  %2764 = vmatpush1.msk.msra.mxu1 %vm412_vm0, %v399_v4  ;;  %v391_v7 = vld [vmem:[%s4363_s1 + $0x1d0] sm:$0xff]  ;;  %v382_v8 = vld [vmem:[%s4363_s1 + $0x188] sm:$0xff]  ;;  %s2828_s11 = sshll.u32 %s4374_s10, 4  ;;  %vm405_vm1 = vcmask 531456   ;;  %v3248_v37 = vmov 0.0  }
   0xe   : > { %453 = vmatprep.subr.mxu0 %v390_v2  ;;  %530 = vmatprep.subr.mxu1 %v392_v5  ;;  %v384_v9 = vld [vmem:[%s4363_s1 + $0x198] sm:$0xff]  ;;  %v381_v10 = vld [vmem:[%s4363_s1 + $0x180] sm:$0xff]  ;;  %v383_v11 = vld [vmem:[%s4363_s1 + $0x190] sm:$0xff]  ;;  %s3432_s26 = scalar_lea.vmem %s4362_s0, %s2828_s11  ;;  %vm1348_vm2 = vcmask 261120   ;;  %vm1530_vm3 = vcmask 130048   ;;  %vm2480_vm4 = vcmask 523264  }
   0xf   : > { %454 = vmatpush1.msra.mxu0 %v389_v6  ;;  %531 = vmatpush1.msra.mxu1 %v391_v7  ;;  %v374_v12 = vld [vmem:[%s4363_s1 + $0x148] sm:$0xff]  ;;  %v376_v13 = vld [vmem:[%s4363_s1 + $0x158] sm:$0xff]  ;;  %v373_v14 = vld [vmem:[%s4363_s1 + $0x140] sm:$0xff]  ;;  %vm3251_vm5 = vmmov 0   ;;  %s2758_s12 = sshll.u32 %s4374_s10, 3 }
  0x10   : > { %455 = vmatprep.subr.mxu0 %v382_v8  ;;  %532 = vmatprep.subr.mxu1 %v384_v9  ;;  %v375_v15 = vld [vmem:[%s4363_s1 + $0x150] sm:$0xff]  ;;  %v366_v16 = vld [vmem:[%s4363_s1 + $0x108] sm:$0xff]  ;;  %v368_v17 = vld [vmem:[%s4363_s1 + $0x118] sm:$0xff] }
  0x11   : > { %456 = vmatpush1.msra.mxu0 %v381_v10  ;;  %533 = vmatpush1.msra.mxu1 %v383_v11  ;;  %v365_v18 = vld [vmem:[%s4363_s1 + $0x100] sm:$0xff]  ;;  %v367_v19 = vld [vmem:[%s4363_s1 + $0x110] sm:$0xff]  ;;  %v358_v20 = vld [vmem:[%s4363_s1 + $0xc8] sm:$0xff] }
  0x12   : > { %457 = vmatprep.subr.mxu0 %v374_v12  ;;  %534 = vmatprep.subr.mxu1 %v376_v13  ;;  %v360_v21 = vld [vmem:[%s4363_s1 + $0xd8] sm:$0xff]  ;;  %v357_v22 = vld [vmem:[%s4363_s1 + $0xc0] sm:$0xff]  ;;  %v359_v23 = vld [vmem:[%s4363_s1 + $0xd0] sm:$0xff] }
  0x13   : > { %458 = vmatpush1.msra.mxu0 %v373_v14  ;;  %535 = vmatpush1.msra.mxu1 %v375_v15  ;;  %v350_v24 = vld [vmem:[%s4363_s1 + $0x88] sm:$0xff]  ;;  %v352_v25 = vld [vmem:[%s4363_s1 + $0x98] sm:$0xff]  ;;  %v349_v26 = vld [vmem:[%s4363_s1 + $0x80] sm:$0xff] }
  0x14   : > { %459 = vmatprep.subr.mxu0 %v366_v16  ;;  %536 = vmatprep.subr.mxu1 %v368_v17  ;;  %v351_v27 = vld [vmem:[%s4363_s1 + $0x90] sm:$0xff]  ;;  %v342_v28 = vld [vmem:[%s4363_s1 + $0x48] sm:$0xff]  ;;  %v344_v29 = vld [vmem:[%s4363_s1 + $0x58] sm:$0xff] }
  0x15   : > { %460 = vmatpush1.msra.mxu0 %v365_v18  ;;  %537 = vmatpush1.msra.mxu1 %v367_v19  ;;  %v341_v30 = vld [vmem:[%s4363_s1 + $0x40] sm:$0xff]  ;;  %v343_v31 = vld [vmem:[%s4363_s1 + $0x50] sm:$0xff]  ;;  %v334_v32 = vld [vmem:[%s4363_s1 + $0x8] sm:$0xff] }
  0x16   : > { %461 = vmatprep.subr.mxu0 %v358_v20  ;;  %538 = vmatprep.subr.mxu1 %v360_v21  ;;  %v336_v33 = vld [vmem:[%s4363_s1 + $0x18] sm:$0xff]  ;;  %v333_v34 = vld [vmem:[%s4363_s1] sm:$0xff]  ;;  %v335_v35 = vld [vmem:[%s4363_s1 + $0x10] sm:$0xff] }
  0x17   : > { %462 = vmatpush1.msra.mxu0 %v357_v22  ;;  %539 = vmatpush1.msra.mxu1 %v359_v23  ;;  %v3441_v36 = vld [vmem:[%s3432_s26] sm:$0xff]  ;;  %v402_v38 = vld [vmem:[%s4363_s1 + $0x228] sm:$0x1]  ;;  %v404_v39 = vld [vmem:[%s4363_s1 + $0x238] sm:$0x1] }
  0x18   : > { %463 = vmatprep.subr.mxu0 %v350_v24  ;;  %540 = vmatprep.subr.mxu1 %v352_v25  ;;  %v401_v40 = vld [vmem:[%s4363_s1 + $0x220] sm:$0x1]  ;;  %v403_v41 = vld [vmem:[%s4363_s1 + $0x230] sm:$0x1]  ;;  %v394_v42 = vld [vmem:[%s4363_s1 + $0x1e8] sm:$0xff] }
  0x19   : > { %464 = vmatpush1.msra.mxu0 %v349_v26  ;;  %541 = vmatpush1.msra.mxu1 %v351_v27  ;;  %v396_v43 = vld [vmem:[%s4363_s1 + $0x1f8] sm:$0xff]  ;;  %v393_v44 = vld [vmem:[%s4363_s1 + $0x1e0] sm:$0xff]  ;;  %v395_v45 = vld [vmem:[%s4363_s1 + $0x1f0] sm:$0xff] }
  0x1a   : > { %465 = vmatprep.subr.mxu0 %v342_v28  ;;  %542 = vmatprep.subr.mxu1 %v344_v29  ;;  %v3478_v46 = vld [vmem:[%s3432_s26 + $0x8] sm:$0xff]  ;;  %v388_v48 = vld [vmem:[%s4363_s1 + $0x1b8] sm:$0xff]  ;;  %v385_v49 = vld [vmem:[%s4363_s1 + $0x1a0] sm:$0xff]  ;;  %s330_s26 = scalar_lea.vmem %s4371_s9, %s2758_s12 }
  0x1b   : > { %466 = vmatpush1.msra.mxu0 %v341_v30  ;;  %543 = vmatpush1.msra.mxu1 %v343_v31  ;;  %v386_v47 = vld [vmem:[%s4363_s1 + $0x1a8] sm:$0xff]  ;;  %v387_v50 = vld [vmem:[%s4363_s1 + $0x1b0] sm:$0xff]  ;;  %v380_v52 = vld [vmem:[%s4363_s1 + $0x178] sm:$0xff] }
  0x1c   : > { %467 = vmatprep.subr.mxu0 %v334_v32  ;;  %544 = vmatprep.subr.mxu1 %v336_v33  ;;  %v378_v51 = vld [vmem:[%s4363_s1 + $0x168] sm:$0xff]  ;;  %v377_v53 = vld [vmem:[%s4363_s1 + $0x160] sm:$0xff]  ;;  %v379_v54 = vld [vmem:[%s4363_s1 + $0x170] sm:$0xff] }
  0x1d   : > { %468 = vmatpush1.msra.mxu0 %v333_v34  ;;  %501 = vmatprep.mubr.f32.mxu0 %v3248_v37  ;;  %v370_v55 = vld [vmem:[%s4363_s1 + $0x128] sm:$0xff]  ;;  %v372_v56 = vld [vmem:[%s4363_s1 + $0x138] sm:$0xff]  ;;  %v369_v57 = vld [vmem:[%s4363_s1 + $0x120] sm:$0xff] }
  0x1e   : > { %545 = vmatpush1.msra.mxu1 %v335_v35  ;;  %578 = vmatprep.mubr.f32.mxu1 %v3248_v37  ;;  %v371_v58 = vld [vmem:[%s4363_s1 + $0x130] sm:$0xff]  ;;  %v362_v59 = vld [vmem:[%s4363_s1 + $0xe8] sm:$0xff]  ;;  %v364_v60 = vld [vmem:[%s4363_s1 + $0xf8] sm:$0xff] }
  0x1f   : > { %2761 = vmatmul.mubr.msk.f32.vlgmr.msra.gmra.mxu0 %vm405_vm1, %v3441_v36  ;;  %2765 = vmatmul.mubr.msk.f32.vlgmr.msra.gmra.mxu1 %vm405_vm1, %v3441_v36  ;;  %v361_v61 = vld [vmem:[%s4363_s1 + $0xe0] sm:$0xff]  ;;  %v363_v62 = vld [vmem:[%s4363_s1 + $0xf0] sm:$0xff]  ;;  %v354_v63 = vld [vmem:[%s4363_s1 + $0xa8] sm:$0xff] }
  0x20   : > { %2767 = vmatprep.subr.msk.mxu0 %vm412_vm0, %v402_v38  ;;  %2771 = vmatprep.subr.msk.mxu1 %vm412_vm0, %v404_v39  ;;  %v356_v0 = vld [vmem:[%s4363_s1 + $0xb8] sm:$0xff]  ;;  %v353_v1 = vld [vmem:[%s4363_s1 + $0xa0] sm:$0xff]  ;;  %v355_v2 = vld [vmem:[%s4363_s1 + $0xb0] sm:$0xff] }
  0x21   : > { %2768 = vmatpush1.msk.msra.mxu0 %vm412_vm0, %v401_v40  ;;  %2772 = vmatpush1.msk.msra.mxu1 %vm412_vm0, %v403_v41  ;;  %v346_v3 = vld [vmem:[%s4363_s1 + $0x68] sm:$0xff]  ;;  %v348_v4 = vld [vmem:[%s4363_s1 + $0x78] sm:$0xff]  ;;  %v345_v5 = vld [vmem:[%s4363_s1 + $0x60] sm:$0xff] }
  0x22   : > { %607 = vmatprep.subr.mxu0 %v394_v42  ;;  %684 = vmatprep.subr.mxu1 %v396_v43  ;;  %v347_v6 = vld [vmem:[%s4363_s1 + $0x70] sm:$0xff]  ;;  %v338_v7 = vld [vmem:[%s4363_s1 + $0x28] sm:$0xff]  ;;  %v340_v8 = vld [vmem:[%s4363_s1 + $0x38] sm:$0xff] }
  0x23   : > { %507 = vmatprep.mubr.f32.mxu0 %v3248_v37  ;;  %584 = vmatprep.mubr.f32.mxu1 %v3248_v37  ;;  %v337_v9 = vld [vmem:[%s4363_s1 + $0x20] sm:$0xff]  ;;  %v339_v10 = vld [vmem:[%s4363_s1 + $0x30] sm:$0xff]  ;;  %v920_v11 = vld [vmem:[%s4364_s2 + $0xf8] sm:$0xff] }
  0x24   : > { %608 = vmatpush1.msra.mxu0 %v393_v44  ;;  %685 = vmatpush1.msra.mxu1 %v395_v45  ;;  %v952_v12 = vld [vmem:[%s4364_s2 + $0x1f8] sm:$0xff]  ;;  %v919_v15 = vld [vmem:[%s4364_s2 + $0xf0] sm:$0xff]  ;;  %v918_v19 = vld [vmem:[%s4364_s2 + $0xe8] sm:$0xff] }
  0x25   : > { %2762 = vmatmul.mubr.msk.f32.gmra.mxu0 %vm405_vm1, %v3478_v46  ;;  %2766 = vmatmul.mubr.msk.f32.gmra.mxu1 %vm405_vm1, %v3478_v46  ;;  %v904_v13 = vld [vmem:[%s4364_s2 + $0x78] sm:$0xff]  ;;  %v951_v16 = vld [vmem:[%s4364_s2 + $0x1f0] sm:$0xff]  ;;  %v950_v20 = vld [vmem:[%s4364_s2 + $0x1e8] sm:$0xff] }
  0x26   : > { %609 = vmatprep.subr.mxu0 %v386_v47  ;;  %686 = vmatprep.subr.mxu1 %v388_v48  ;;  %v936_v14 = vld [vmem:[%s4364_s2 + $0x178] sm:$0xff]  ;;  %v903_v17 = vld [vmem:[%s4364_s2 + $0x70] sm:$0xff]  ;;  %v902_v21 = vld [vmem:[%s4364_s2 + $0x68] sm:$0xff] }
  0x27   : > { %610 = vmatpush1.msra.mxu0 %v385_v49  ;;  %687 = vmatpush1.msra.mxu1 %v387_v50  ;;  %v935_v18 = vld [vmem:[%s4364_s2 + $0x170] sm:$0xff]  ;;  %v934_v22 = vld [vmem:[%s4364_s2 + $0x168] sm:$0xff]  ;;  %v917_v23 = vld [vmem:[%s4364_s2 + $0xe0] sm:$0xff] }
  0x28   : > { %611 = vmatprep.subr.mxu0 %v378_v51  ;;  %688 = vmatprep.subr.mxu1 %v380_v52  ;;  %v949_v24 = vld [vmem:[%s4364_s2 + $0x1e0] sm:$0xff]  ;;  %v916_v27 = vld [vmem:[%s4364_s2 + $0xd8] sm:$0xff]  ;;  %v915_v31 = vld [vmem:[%s4364_s2 + $0xd0] sm:$0xff] }
  0x29   : > { %612 = vmatpush1.msra.mxu0 %v377_v53  ;;  %689 = vmatpush1.msra.mxu1 %v379_v54  ;;  %v901_v25 = vld [vmem:[%s4364_s2 + $0x60] sm:$0xff]  ;;  %v948_v28 = vld [vmem:[%s4364_s2 + $0x1d8] sm:$0xff]  ;;  %v947_v32 = vld [vmem:[%s4364_s2 + $0x1d0] sm:$0xff] }
  0x2a   : > { %613 = vmatprep.subr.mxu0 %v370_v55  ;;  %690 = vmatprep.subr.mxu1 %v372_v56  ;;  %v933_v26 = vld [vmem:[%s4364_s2 + $0x160] sm:$0xff]  ;;  %v900_v29 = vld [vmem:[%s4364_s2 + $0x58] sm:$0xff]  ;;  %v899_v33 = vld [vmem:[%s4364_s2 + $0x50] sm:$0xff] }
  0x2b   : > { %614 = vmatpush1.msra.mxu0 %v369_v57  ;;  %691 = vmatpush1.msra.mxu1 %v371_v58  ;;  %v932_v30 = vld [vmem:[%s4364_s2 + $0x158] sm:$0xff]  ;;  %v931_v34 = vld [vmem:[%s4364_s2 + $0x150] sm:$0xff]  ;;  %v914_v35 = vld [vmem:[%s4364_s2 + $0xc8] sm:$0xff] }
  0x2c   : > { %615 = vmatprep.subr.mxu0 %v362_v59  ;;  %692 = vmatprep.subr.mxu1 %v364_v60  ;;  %v898_v38 = vld [vmem:[%s4364_s2 + $0x48] sm:$0xff]  ;;  %v913_v40 = vld [vmem:[%s4364_s2 + $0xc0] sm:$0xff]  ;;  %v912_v44 = vld [vmem:[%s4364_s2 + $0xb8] sm:$0xff] }
  0x2d   : > { %616 = vmatpush1.msra.mxu0 %v361_v61  ;;  %693 = vmatpush1.msra.mxu1 %v363_v62  ;;  %v930_v39 = vld [vmem:[%s4364_s2 + $0x148] sm:$0xff]  ;;  %v945_v41 = vld [vmem:[%s4364_s2 + $0x1c0] sm:$0xff]  ;;  %v944_v45 = vld [vmem:[%s4364_s2 + $0x1b8] sm:$0xff] }
  0x2e   : > { %617 = vmatprep.subr.mxu0 %v354_v63  ;;  %694 = vmatprep.subr.mxu1 %v356_v0  ;;  %v897_v42 = vld [vmem:[%s4364_s2 + $0x40] sm:$0xff]  ;;  %v928_v47 = vld [vmem:[%s4364_s2 + $0x138] sm:$0xff]  ;;  %v911_v48 = vld [vmem:[%s4364_s2 + $0xb0] sm:$0xff] }
  0x2f   : > { %618 = vmatpush1.msra.mxu0 %v353_v1  ;;  %695 = vmatpush1.msra.mxu1 %v355_v2  ;;  %v929_v43 = vld [vmem:[%s4364_s2 + $0x140] sm:$0xff]  ;;  %v943_v49 = vld [vmem:[%s4364_s2 + $0x1b0] sm:$0xff]  ;;  %v910_v52 = vld [vmem:[%s4364_s2 + $0xa8] sm:$0xff] }
  0x30   : > { %619 = vmatprep.subr.mxu0 %v346_v3  ;;  %696 = vmatprep.subr.mxu1 %v348_v4  ;;  %v895_v50 = vld [vmem:[%s4364_s2 + $0x30] sm:$0xff]  ;;  %v942_v53 = vld [vmem:[%s4364_s2 + $0x1a8] sm:$0xff]  ;;  %v909_v56 = vld [vmem:[%s4364_s2 + $0xa0] sm:$0xff] }
  0x31   : > { %620 = vmatpush1.msra.mxu0 %v345_v5  ;;  %697 = vmatpush1.msra.mxu1 %v347_v6  ;;  %v927_v51 = vld [vmem:[%s4364_s2 + $0x130] sm:$0xff]  ;;  %v894_v54 = vld [vmem:[%s4364_s2 + $0x28] sm:$0xff]  ;;  %v941_v57 = vld [vmem:[%s4364_s2 + $0x1a0] sm:$0xff] }
  0x32   : > { %621 = vmatprep.subr.mxu0 %v338_v7  ;;  %698 = vmatprep.subr.mxu1 %v340_v8  ;;  %v926_v55 = vld [vmem:[%s4364_s2 + $0x128] sm:$0xff]  ;;  %v893_v58 = vld [vmem:[%s4364_s2 + $0x20] sm:$0xff]  ;;  %v908_v60 = vld [vmem:[%s4364_s2 + $0x98] sm:$0xff] }
  0x33   : > { %622 = vmatpush1.msra.mxu0 %v337_v9  ;;  %655 = vmatprep.mubr.f32.mxu0 %v3248_v37  ;;  %v925_v59 = vld [vmem:[%s4364_s2 + $0x120] sm:$0xff]  ;;  %v940_v61 = vld [vmem:[%s4364_s2 + $0x198] sm:$0xff]  ;;  %v907_v0 = vld [vmem:[%s4364_s2 + $0x90] sm:$0xff] }
  0x34   : > { %699 = vmatpush1.msra.mxu1 %v339_v10  ;;  %732 = vmatprep.mubr.f32.mxu1 %v3248_v37  ;;  %v892_v62 = vld [vmem:[%s4364_s2 + $0x18] sm:$0xff]  ;;  %v939_v1 = vld [vmem:[%s4364_s2 + $0x190] sm:$0xff]  ;;  %v906_v4 = vld [vmem:[%s4364_s2 + $0x88] sm:$0xff] }
  0x35   : > { %2769 = vmatmul.mubr.msk.f32.vlgmr.msra.gmra.mxu0 %vm405_vm1, %v3441_v36  ;;  %2773 = vmatmul.mubr.msk.f32.vlgmr.msra.gmra.mxu1 %vm405_vm1, %v3441_v36  ;;  %v946_v36 = vld [vmem:[%s4364_s2 + $0x1c8] sm:$0xff]  ;;  %v924_v63 = vld [vmem:[%s4364_s2 + $0x118] sm:$0xff]  ;;  %v891_v2 = vld [vmem:[%s4364_s2 + $0x10] sm:$0xff] }
  0x36   : > { %661 = vmatprep.mubr.f32.mxu0 %v3248_v37  ;;  %738 = vmatprep.mubr.f32.mxu1 %v3248_v37  ;;  %v923_v3 = vld [vmem:[%s4364_s2 + $0x110] sm:$0xff]  ;;  %v938_v5 = vld [vmem:[%s4364_s2 + $0x188] sm:$0xff]  ;;  %v905_v8 = vld [vmem:[%s4364_s2 + $0x80] sm:$0xff] }
  0x37   : > { %2829 = vmatprep.subr.mxu0 %v920_v11  ;;  %2867 = vmatprep.subr.mxu1 %v952_v12  ;;  %v890_v6 = vld [vmem:[%s4364_s2 + $0x8] sm:$0xff]  ;;  %v937_v9 = vld [vmem:[%s4364_s2 + $0x180] sm:$0xff]  ;;  %v984_v12 = vld [vmem:[%s4364_s2 + $0x2f8] sm:$0xff] }
  0x38   : > { %2830 = vmatpush3.msra.mxu0 %v904_v13  ;;  %2868 = vmatpush3.msra.mxu1 %v936_v14  ;;  %v922_v7 = vld [vmem:[%s4364_s2 + $0x108] sm:$0xff]  ;;  %v889_v10 = vld [vmem:[%s4364_s2] sm:$0xff]  ;;  %v1016_v13 = vld [vmem:[%s4364_s2 + $0x3f8] sm:$0xff] }
  0x39   : > { %2770 = vmatmul.mubr.msk.f32.gmra.mxu0 %vm405_vm1, %v3478_v46  ;;  %2774 = vmatmul.mubr.msk.f32.gmra.mxu1 %vm405_vm1, %v3478_v46  ;;  %v896_v46 = vld [vmem:[%s4364_s2 + $0x38] sm:$0xff]  ;;  %v921_v11 = vld [vmem:[%s4364_s2 + $0x100] sm:$0xff] }
  0x3a   : > { %2831 = vmatprep.subr.mxu0 %v919_v15  ;;  %2869 = vmatprep.subr.mxu1 %v951_v16 }
  0x3b   : > { %2832 = vmatpush3.msra.mxu0 %v903_v17  ;;  %2870 = vmatpush3.msra.mxu1 %v935_v18 }
  0x3c   : > { %2833 = vmatprep.subr.mxu0 %v918_v19  ;;  %2871 = vmatprep.subr.mxu1 %v950_v20 }
  0x3d   : > { %2834 = vmatpush3.msra.mxu0 %v902_v21  ;;  %2872 = vmatpush3.msra.mxu1 %v934_v22 }
  0x3e   : > { %2835 = vmatprep.subr.mxu0 %v917_v23  ;;  %2873 = vmatprep.subr.mxu1 %v949_v24 }
  0x3f   : > { %2836 = vmatpush3.msra.mxu0 %v901_v25  ;;  %2874 = vmatpush3.msra.mxu1 %v933_v26 }
  0x40   : > { %2837 = vmatprep.subr.mxu0 %v916_v27  ;;  %2875 = vmatprep.subr.mxu1 %v948_v28 }
  0x41   : > { %2838 = vmatpush3.msra.mxu0 %v900_v29  ;;  %2876 = vmatpush3.msra.mxu1 %v932_v30 }
  0x42   : > { %2839 = vmatprep.subr.mxu0 %v915_v31  ;;  %2877 = vmatprep.subr.mxu1 %v947_v32 }
  0x43   : > { %2840 = vmatpush3.msra.mxu0 %v899_v33  ;;  %2878 = vmatpush3.msra.mxu1 %v931_v34 }
  0x44   : > { %2841 = vmatprep.subr.mxu0 %v914_v35  ;;  %2879 = vmatprep.subr.mxu1 %v946_v36 }
  0x45   : > { %2842 = vmatpush3.msra.mxu0 %v898_v38  ;;  %2880 = vmatpush3.msra.mxu1 %v930_v39 }
  0x46   : > { %2843 = vmatprep.subr.mxu0 %v913_v40  ;;  %2881 = vmatprep.subr.mxu1 %v945_v41 }
  0x47   : > { %2844 = vmatpush3.msra.mxu0 %v897_v42  ;;  %2882 = vmatpush3.msra.mxu1 %v929_v43 }
  0x48   : > { %2845 = vmatprep.subr.mxu0 %v912_v44  ;;  %2883 = vmatprep.subr.mxu1 %v944_v45 }
  0x49   : > { %2846 = vmatpush3.msra.mxu0 %v896_v46  ;;  %2884 = vmatpush3.msra.mxu1 %v928_v47 }
  0x4a   : > { %2847 = vmatprep.subr.mxu0 %v911_v48  ;;  %2885 = vmatprep.subr.mxu1 %v943_v49 }
  0x4b   : > { %2848 = vmatpush3.msra.mxu0 %v895_v50  ;;  %2886 = vmatpush3.msra.mxu1 %v927_v51 }
  0x4c   : > { %2849 = vmatprep.subr.mxu0 %v910_v52  ;;  %2887 = vmatprep.subr.mxu1 %v942_v53 }
  0x4d   : > { %2850 = vmatpush3.msra.mxu0 %v894_v54  ;;  %2888 = vmatpush3.msra.mxu1 %v926_v55 }
  0x4e   : > { %2851 = vmatprep.subr.mxu0 %v909_v56  ;;  %2889 = vmatprep.subr.mxu1 %v941_v57 }
  0x4f   : > { %2852 = vmatpush3.msra.mxu0 %v893_v58  ;;  %2890 = vmatpush3.msra.mxu1 %v925_v59 }
  0x50   : > { %2853 = vmatprep.subr.mxu0 %v908_v60  ;;  %2891 = vmatprep.subr.mxu1 %v940_v61 }
  0x51   : > { %2854 = vmatpush3.msra.mxu0 %v892_v62  ;;  %2892 = vmatpush3.msra.mxu1 %v924_v63 }
  0x52   : > { %2855 = vmatprep.subr.mxu0 %v907_v0  ;;  %2893 = vmatprep.subr.mxu1 %v939_v1 }
  0x53   : > { %2856 = vmatpush3.msra.mxu0 %v891_v2  ;;  %2894 = vmatpush3.msra.mxu1 %v923_v3 }
  0x54   : > { %2857 = vmatprep.subr.mxu0 %v906_v4  ;;  %2895 = vmatprep.subr.mxu1 %v938_v5 }
  0x55   : > { %2858 = vmatpush3.msra.mxu0 %v890_v6  ;;  %2896 = vmatpush3.msra.mxu1 %v922_v7 }
  0x56   : > { %2859 = vmatprep.subr.mxu0 %v905_v8  ;;  %2897 = vmatprep.subr.mxu1 %v937_v9 }
  0x57   : > { %2860 = vmatpush3.msra.mxu0 %v889_v10  ;;  %2898 = vmatpush3.msra.mxu1 %v921_v11 }
  0x58   : > { %2905 = vmatprep.subr.mxu0 %v984_v12  ;;  %2943 = vmatprep.subr.mxu1 %v1016_v13 }
  0xdf   : > { %v3780_v14 = vpop.f32.mrf.mxu0  ;;  %v3782_v15 = vpop.f32.mrf.mxu1 }
  0xe0   : > { %v761_v16 = vmul.f32 0.044715, %v3780_v14  ;;  %v763_v17 = vmul.f32 0.044715, %v3782_v15 }
  0xe1   : > { %v3786_v18 = vpop.f32.mrf.mxu0  ;;  %v3788_v19 = vpop.f32.mrf.mxu1 }
  0xe2   : > { %v777_v20 = vmul.f32 %v761_v16, %v3780_v14  ;;  %v779_v21 = vmul.f32 %v763_v17, %v3782_v15  ;;  %v762_v22 = vmul.f32 0.044715, %v3786_v18  ;;  %v764_v23 = vmul.f32 0.044715, %v3788_v19 }
  0xe3   : > { %v745_v17 = vmul.f32 0.5, %v3780_v14 }
  0xe4   : > { %v793_v24 = vmul.f32 %v777_v20, %v3780_v14  ;;  %v795_v25 = vmul.f32 %v779_v21, %v3782_v15  ;;  %v778_v26 = vmul.f32 %v762_v22, %v3786_v18  ;;  %v780_v27 = vmul.f32 %v764_v23, %v3788_v19 }
  0xe5   : > { %v3798_v28 = vpop.f32.mrf.mxu0  ;;  %v3800_v29 = vpop.f32.mrf.mxu1  ;;  %v747_v20 = vmul.f32 0.5, %v3782_v15  ;;  %v746_v23 = vmul.f32 0.5, %v3786_v18 }
  0xe6   : > { %v809_v30 = vadd.f32 %v793_v24, %v3780_v14  ;;  %v794_v31 = vmul.f32 %v778_v26, %v3786_v18  ;;  %v796_v32 = vmul.f32 %v780_v27, %v3788_v19  ;;  %v769_v33 = vmul.f32 0.044715, %v3798_v28 }
  0xe7   : > { %v771_v34 = vmul.f32 0.044715, %v3800_v29  ;;  %v3807_v35 = vpop.f32.mrf.mxu0  ;;  %v3809_v36 = vpop.f32.mrf.mxu1  ;;  %v811_v38 = vadd.f32 %v795_v25, %v3782_v15  ;;  %v748_v27 = vmul.f32 0.5, %v3788_v19 }
  0xe8   : > { %v810_v39 = vadd.f32 %v794_v31, %v3786_v18  ;;  %v785_v40 = vmul.f32 %v769_v33, %v3798_v28  ;;  %v770_v42 = vmul.f32 0.044715, %v3807_v35  ;;  %v772_v43 = vmul.f32 0.044715, %v3809_v36 }
  0xe9   : > { %v787_v41 = vmul.f32 %v771_v34, %v3800_v29  ;;  %v825_v44 = vmul.f32 0.7978846, %v809_v30  ;;  %v812_v45 = vadd.f32 %v796_v32, %v3788_v19  ;;  %v827_v51 = vmul.f32 0.7978846, %v811_v38 }
  0xea   : > { %v801_v46 = vmul.f32 %v785_v40, %v3798_v28  ;;  %v786_v48 = vmul.f32 %v770_v42, %v3807_v35  ;;  %v826_v49 = vmul.f32 0.7978846, %v810_v39  ;;  %v788_v50 = vmul.f32 %v772_v43, %v3809_v36 }
  0xeb   : > { %v803_v47 = vmul.f32 %v787_v41, %v3800_v29  ;;  %3160 = vtanh.f32 %v825_v44  ;;  %v828_v54 = vmul.f32 0.7978846, %v812_v45  ;;  %v3858_v30 = vmul.f32 0.5, %v3798_v28 }
  0xec   : > { %v817_v52 = vadd.f32 %v801_v46, %v3798_v28  ;;  %v802_v53 = vmul.f32 %v786_v48, %v3807_v35  ;;  %v804_v56 = vmul.f32 %v788_v50, %v3809_v36  ;;  %3162 = vtanh.f32 %v826_v49  ;;  %v968_v50 = vld [vmem:[%s4364_s2 + $0x278] sm:$0xff] }
  0xed   : > { %v819_v55 = vadd.f32 %v803_v47, %v3800_v29  ;;  %3164 = vtanh.f32 %v827_v51  ;;  %v754_v32 = vmul.f32 0.5, %v3807_v35  ;;  %v755_v33 = vmul.f32 0.5, %v3800_v29 }
  0xee   : > { %v818_v57 = vadd.f32 %v802_v53, %v3807_v35  ;;  %v820_v58 = vadd.f32 %v804_v56, %v3809_v36  ;;  %v833_v59 = vmul.f32 0.7978846, %v817_v52  ;;  %3166 = vtanh.f32 %v828_v54  ;;  %v983_v56 = vld [vmem:[%s4364_s2 + $0x2f0] sm:$0xff] }
  0xef   : > { %v835_v61 = vmul.f32 0.7978846, %v819_v55  ;;  %v756_v43 = vmul.f32 0.5, %v3809_v36 }
  0xf0   : > { %v834_v60 = vmul.f32 0.7978846, %v818_v57  ;;  %v836_v62 = vmul.f32 0.7978846, %v820_v58 }
  0xf2   : > { %3168 = vtanh.f32 %v834_v60  ;;  %v967_v60 = vld [vmem:[%s4364_s2 + $0x270] sm:$0xff] }
  0xf3   : > { %3170 = vtanh.f32 %v836_v62  ;;  %v1015_v62 = vld [vmem:[%s4364_s2 + $0x3f0] sm:$0xff] }
  0xf4   : > { %3172 = vtanh.f32 %v833_v59  ;;  %v1000_v59 = vld [vmem:[%s4364_s2 + $0x378] sm:$0xff] }
  0xf5   : > { %v3828_v63 = vpop.f32.mrf.mxu0  ;;  %v3830_v0 = vpop.f32.mrf.mxu1  ;;  %3174 = vtanh.f32 %v835_v61 }
  0xf6   : > { %v765_v10 = vmul.f32 0.044715, %v3828_v63  ;;  %v767_v11 = vmul.f32 0.044715, %v3830_v0 }
  0xf7   : > { %v3832_v1 = vpop.f32.mrf.mxu0  ;;  %v3834_v2 = vpop.f32.mrf.mxu1 }
  0xf8   : > { %v766_v3 = vmul.f32 0.044715, %v3832_v1  ;;  %v768_v4 = vmul.f32 0.044715, %v3834_v2  ;;  %v3161_v8 = vpop.eup %3160  ;;  %v781_v18 = vmul.f32 %v765_v10, %v3828_v63  ;;  %v783_v38 = vmul.f32 %v767_v11, %v3830_v0  ;;  %v999_v10 = vld [vmem:[%s4364_s2 + $0x370] sm:$0xff] }
  0xf9   : > { %v3838_v5 = vpop.f32.mrf.mxu0  ;;  %v3840_v6 = vpop.f32.mrf.mxu1  ;;  %v857_v25 = vadd.f32 1.0, %v3161_v8 }
  0xfa   : > { %v782_v7 = vmul.f32 %v766_v3, %v3832_v1  ;;  %v784_v9 = vmul.f32 %v768_v4, %v3834_v2  ;;  %v3163_v16 = vpop.eup %3162  ;;  %v773_v42 = vmul.f32 0.044715, %v3838_v5  ;;  %v775_v48 = vmul.f32 0.044715, %v3840_v6 }
  0xfb   : > { %v3847_v13 = vpop.f32.mrf.mxu0  ;;  %v3852_v22 = vpop.f32.mrf.mxu1  ;;  %v858_v19 = vadd.f32 1.0, %v3163_v16  ;;  %v873_v45 = vmul.f32 %v857_v25, %v745_v17  ;;  %v797_v53 = vmul.f32 %v781_v18, %v3828_v63  ;;  %v799_v36 = vmul.f32 %v783_v38, %v3830_v0  ;;  %v1014_v16 = vld [vmem:[%s4364_s2 + $0x3e8] sm:$0xff]  ;;  %v980_v18 = vld [vmem:[%s4364_s2 + $0x2d8] sm:$0xff] }
  0xfc   : > { %v798_v12 = vmul.f32 %v782_v7, %v3832_v1  ;;  %v800_v21 = vmul.f32 %v784_v9, %v3834_v2  ;;  %v3165_v24 = vpop.eup %3164  ;;  %v774_v15 = vmul.f32 0.044715, %v3847_v13  ;;  %v776_v39 = vmul.f32 0.044715, %v3852_v22  ;;  %v966_v25 = vld [vmem:[%s4364_s2 + $0x268] sm:$0xff]  ;;  %v1012_v38 = vld [vmem:[%s4364_s2 + $0x3d8] sm:$0xff] }
  0xfd   : > { %v3167_v31 = vpop.eup %3166  ;;  %v859_v28 = vadd.f32 1.0, %v3165_v24  ;;  %v874_v46 = vmul.f32 %v858_v19, %v746_v23  ;;  %v789_v58 = vmul.f32 %v773_v42, %v3838_v5  ;;  %v791_v8 = vmul.f32 %v775_v48, %v3840_v6 }
  0xfe   : > { %v814_v26 = vadd.f32 %v798_v12, %v3832_v1  ;;  %v816_v14 = vadd.f32 %v800_v21, %v3834_v2  ;;  %v860_v29 = vadd.f32 1.0, %v3167_v31  ;;  %v790_v49 = vmul.f32 %v774_v15, %v3847_v13  ;;  %v982_v12 = vld [vmem:[%s4364_s2 + $0x2e8] sm:$0xff] }
  0xff   : > { %v3169_v34 = vpop.eup %3168  ;;  %v792_v54 = vmul.f32 %v776_v39, %v3852_v22  ;;  %1086 = vmatprep.mubr.f32.mxu0 %v874_v46  ;;  %v875_v57 = vmul.f32 %v859_v28, %v747_v20  ;;  %v813_v17 = vadd.f32 %v797_v53, %v3828_v63  ;;  %v815_v20 = vadd.f32 %v799_v36, %v3830_v0  ;;  %v996_v28 = vld [vmem:[%s4364_s2 + $0x358] sm:$0xff]  ;;  %v995_v46 = vld [vmem:[%s4364_s2 + $0x350] sm:$0xff]  ;;  %v977_v36 = vld [vmem:[%s4364_s2 + $0x2c0] sm:$0xff] }
 0x100   : > { %v3171_v40 = vpop.eup %3170  ;;  %v830_v41 = vmul.f32 0.7978846, %v814_v26  ;;  %v832_v35 = vmul.f32 0.7978846, %v816_v14  ;;  %v866_v51 = vadd.f32 1.0, %v3169_v34  ;;  %v876_v55 = vmul.f32 %v860_v29, %v748_v27  ;;  %1087 = vmatmul.mubr.f32.vlgmr.msra.gmra.mxu0 %v873_v45  ;;  %v998_v26 = vld [vmem:[%s4364_s2 + $0x368] sm:$0xff] }
 0x101   : > { %v3173_v44 = vpop.eup %3172  ;;  %v868_v52 = vadd.f32 1.0, %v3171_v40  ;;  %2906 = vmatpush3.msra.mxu0 %v968_v50  ;;  %v806_v9 = vmul.f32 %v790_v49, %v3847_v13  ;;  %v808_v11 = vmul.f32 %v792_v54, %v3852_v22  ;;  %v805_v21 = vmul.f32 %v789_v58, %v3838_v5  ;;  %v981_v14 = vld [vmem:[%s4364_s2 + $0x2e0] sm:$0xff]  ;;  %v964_v40 = vld [vmem:[%s4364_s2 + $0x258] sm:$0xff]  ;;  %v978_v29 = vld [vmem:[%s4364_s2 + $0x2c8] sm:$0xff] }
 0x102   : > { %v3175_v47 = vpop.eup %3174  ;;  %v882_v61 = vmul.f32 %v866_v51, %v754_v32  ;;  %3176 = vtanh.f32 %v830_v41  ;;  %1161 = vmatprep.mubr.f32.mxu1 %v876_v55  ;;  %v865_v4 = vadd.f32 1.0, %v3173_v44  ;;  %2907 = vmatprep.subr.mxu0 %v983_v56  ;;  %v807_v27 = vmul.f32 %v791_v8, %v3840_v6  ;;  %v965_v32 = vld [vmem:[%s4364_s2 + $0x260] sm:$0xff]  ;;  %v1011_v44 = vld [vmem:[%s4364_s2 + $0x3d0] sm:$0xff]  ;;  %v962_v50 = vld [vmem:[%s4364_s2 + $0x248] sm:$0xff] }
 0x103   : > { %v884_v3 = vmul.f32 %v868_v52, %v756_v43  ;;  %v867_v7 = vadd.f32 1.0, %v3175_v47  ;;  %3178 = vtanh.f32 %v832_v35  ;;  %1162 = vmatmul.mubr.f32.vlgmr.msra.gmra.mxu1 %v875_v57  ;;  %2908 = vmatpush3.msra.mxu0 %v967_v60  ;;  %v822_v31 = vadd.f32 %v806_v9, %v3847_v13  ;;  %v979_v43 = vld [vmem:[%s4364_s2 + $0x2d0] sm:$0xff]  ;;  %v1010_v47 = vld [vmem:[%s4364_s2 + $0x3c8] sm:$0xff]  ;;  %v1009_v54 = vld [vmem:[%s4364_s2 + $0x3c0] sm:$0xff] }
 0x104   : > { %2944 = vmatpush3.msra.mxu1 %v1000_v59  ;;  %1091 = vmatprep.mubr.f32.mxu0 %v882_v61  ;;  %v881_v23 = vmul.f32 %v865_v4, %v3858_v30  ;;  %v1013_v30 = vld [vmem:[%s4364_s2 + $0x3e0] sm:$0xff]  ;;  %v824_v15 = vadd.f32 %v808_v11, %v3852_v22  ;;  %v829_v34 = vmul.f32 0.7978846, %v813_v17  ;;  %v831_v39 = vmul.f32 0.7978846, %v815_v20  ;;  %v963_v35 = vld [vmem:[%s4364_s2 + $0x250] sm:$0xff] }
 0x105   : > { %2945 = vmatprep.subr.mxu1 %v1015_v62  ;;  %1166 = vmatprep.mubr.f32.mxu1 %v884_v3  ;;  %v883_v24 = vmul.f32 %v867_v7, %v755_v33  ;;  %v997_v33 = vld [vmem:[%s4364_s2 + $0x360] sm:$0xff]  ;;  %v821_v19 = vadd.f32 %v805_v21, %v3838_v5  ;;  %v823_v41 = vadd.f32 %v807_v27, %v3840_v6  ;;  %v838_v42 = vmul.f32 0.7978846, %v822_v31  ;;  %v994_v51 = vld [vmem:[%s4364_s2 + $0x348] sm:$0xff]  ;;  %v976_v60 = vld [vmem:[%s4364_s2 + $0x2b8] sm:$0xff] }
 0x106   : > { %2946 = vmatpush3.msra.mxu1 %v999_v10  ;;  %2909 = vmatprep.subr.mxu0 %v982_v12  ;;  %v840_v45 = vmul.f32 0.7978846, %v824_v15  ;;  %3180 = vtanh.f32 %v829_v34  ;;  %v961_v56 = vld [vmem:[%s4364_s2 + $0x240] sm:$0xff]  ;;  %v750_v58 = vmul.f32 0.5, %v3832_v1  ;;  %v1008_v61 = vld [vmem:[%s4364_s2 + $0x3b8] sm:$0xff]  ;;  %v752_v62 = vmul.f32 0.5, %v3834_v2 }
 0x107   : > { %2947 = vmatprep.subr.mxu1 %v1014_v16  ;;  %1092 = vmatmul.mubr.f32.gmra.mxu0 %v881_v23  ;;  %3182 = vtanh.f32 %v831_v39  ;;  %v837_v49 = vmul.f32 0.7978846, %v821_v19  ;;  %v839_v53 = vmul.f32 0.7978846, %v823_v41  ;;  %v993_v57 = vld [vmem:[%s4364_s2 + $0x340] sm:$0xff]  ;;  %v960_v1 = vld [vmem:[%s4364_s2 + $0x238] sm:$0xff] }
 0x108   : > { %1167 = vmatmul.mubr.f32.gmra.mxu1 %v883_v24  ;;  %2910 = vmatpush3.msra.mxu0 %v966_v25  ;;  %3184 = vtanh.f32 %v838_v42  ;;  %v992_v3 = vld [vmem:[%s4364_s2 + $0x338] sm:$0xff]  ;;  %v975_v7 = vld [vmem:[%s4364_s2 + $0x2b0] sm:$0xff]  ;;  %v974_v11 = vld [vmem:[%s4364_s2 + $0x2a8] sm:$0xff] }
 0x109   : > { %2948 = vmatpush3.msra.mxu1 %v998_v26  ;;  %2911 = vmatprep.subr.mxu0 %v981_v14  ;;  %3186 = vtanh.f32 %v840_v45  ;;  %v1007_v2 = vld [vmem:[%s4364_s2 + $0x3b0] sm:$0xff]  ;;  %v1006_v12 = vld [vmem:[%s4364_s2 + $0x3a8] sm:$0xff]  ;;  %v973_v20 = vld [vmem:[%s4364_s2 + $0x2a0] sm:$0xff] }
 0x10a   : > { %2949 = vmatprep.subr.mxu1 %v1013_v30  ;;  %2912 = vmatpush3.msra.mxu0 %v965_v32  ;;  %3188 = vtanh.f32 %v837_v49  ;;  %v959_v9 = vld [vmem:[%s4364_s2 + $0x230] sm:$0xff]  ;;  %v958_v16 = vld [vmem:[%s4364_s2 + $0x228] sm:$0xff]  ;;  %v1005_v21 = vld [vmem:[%s4364_s2 + $0x3a0] sm:$0xff] }
 0x10b   : > { %2950 = vmatpush3.msra.mxu1 %v997_v33  ;;  %2913 = vmatprep.subr.mxu0 %v980_v18  ;;  %3190 = vtanh.f32 %v839_v53  ;;  %v991_v10 = vld [vmem:[%s4364_s2 + $0x330] sm:$0xff]  ;;  %v990_v17 = vld [vmem:[%s4364_s2 + $0x328] sm:$0xff]  ;;  %v957_v23 = vld [vmem:[%s4364_s2 + $0x220] sm:$0xff] }
 0x10c   : > { %2951 = vmatprep.subr.mxu1 %v1012_v38  ;;  %2914 = vmatpush3.msra.mxu0 %v964_v40  ;;  %v989_v24 = vld [vmem:[%s4364_s2 + $0x320] sm:$0xff]  ;;  %v972_v26 = vld [vmem:[%s4364_s2 + $0x298] sm:$0xff]  ;;  %v971_v32 = vld [vmem:[%s4364_s2 + $0x290] sm:$0xff] }
 0x10d   : > { %2952 = vmatpush3.msra.mxu1 %v996_v28  ;;  %2915 = vmatprep.subr.mxu0 %v979_v43  ;;  %v1004_v27 = vld [vmem:[%s4364_s2 + $0x398] sm:$0xff]  ;;  %v1003_v33 = vld [vmem:[%s4364_s2 + $0x390] sm:$0xff]  ;;  %v970_v39 = vld [vmem:[%s4364_s2 + $0x288] sm:$0xff] }
 0x10e   : > { %2953 = vmatprep.subr.mxu1 %v1011_v44  ;;  %2916 = vmatpush3.msra.mxu0 %v963_v35  ;;  %v956_v14 = vld [vmem:[%s4364_s2 + $0x218] sm:$0xff]  ;;  %v955_v18 = vld [vmem:[%s4364_s2 + $0x210] sm:$0xff]  ;;  %v1002_v19 = vld [vmem:[%s4364_s2 + $0x388] sm:$0xff] }
 0x10f   : > { %v3177_v48 = vpop.eup %3176  ;;  %2954 = vmatpush3.msra.mxu1 %v995_v46  ;;  %2917 = vmatprep.subr.mxu0 %v978_v29  ;;  %v988_v30 = vld [vmem:[%s4364_s2 + $0x318] sm:$0xff]  ;;  %v987_v38 = vld [vmem:[%s4364_s2 + $0x310] sm:$0xff]  ;;  %v954_v42 = vld [vmem:[%s4364_s2 + $0x208] sm:$0xff] }
 0x110   : > { %v3179_v52 = vpop.eup %3178  ;;  %v862_v55 = vadd.f32 1.0, %v3177_v48  ;;  %2955 = vmatprep.subr.mxu1 %v1010_v47  ;;  %2918 = vmatpush3.msra.mxu0 %v962_v50  ;;  %v986_v43 = vld [vmem:[%s4364_s2 + $0x308] sm:$0xff]  ;;  %v969_v45 = vld [vmem:[%s4364_s2 + $0x280] sm:$0xff]  ;;  %v749_v47 = vmul.f32 0.5, %v3828_v63  ;;  %v751_v48 = vmul.f32 0.5, %v3830_v0 }
 0x111   : > { %v864_v59 = vadd.f32 1.0, %v3179_v52  ;;  %2956 = vmatpush3.msra.mxu1 %v994_v51  ;;  %2919 = vmatprep.subr.mxu0 %v977_v36  ;;  %v1001_v35 = vld [vmem:[%s4364_s2 + $0x380] sm:$0xff]  ;;  %v758_v51 = vmul.f32 0.5, %v3847_v13  ;;  %v760_v52 = vmul.f32 0.5, %v3852_v22 }
 0x112   : > { %2957 = vmatprep.subr.mxu1 %v1009_v54  ;;  %v878_v4 = vmul.f32 %v862_v55, %v750_v58  ;;  %2920 = vmatpush3.msra.mxu0 %v961_v56  ;;  %v953_v49 = vld [vmem:[%s4364_s2 + $0x200] sm:$0xff]  ;;  %v757_v56 = vmul.f32 0.5, %v3838_v5  ;;  %v1347_v58 = vld [vmem:[%s4365_s3 + $0x18] sm:$0xff]  ;;  %v1345_v5 = vld [vmem:[%s4365_s3 + $0x8] sm:$0xff] }
 0x113   : > { %2958 = vmatpush3.msra.mxu1 %v993_v57  ;;  %v880_v8 = vmul.f32 %v864_v59, %v752_v62  ;;  %2921 = vmatprep.subr.mxu0 %v976_v60  ;;  %v3181_v25 = vpop.eup %3180  ;;  %v985_v50 = vld [vmem:[%s4364_s2 + $0x300] sm:$0xff]  ;;  %v759_v57 = vmul.f32 0.5, %v3840_v6  ;;  %v1346_v59 = vld [vmem:[%s4365_s3 + $0x10] sm:$0xff] }
 0x114   : > { %2959 = vmatprep.subr.mxu1 %v1008_v61  ;;  %2922 = vmatpush3.msra.mxu0 %v960_v1  ;;  %v3183_v31 = vpop.eup %3182  ;;  %v861_v28 = vadd.f32 1.0, %v3181_v25  ;;  %v1344_v6 = vld [vmem:[%s4365_s3] sm:$0xff] }
 0x115   : > { %2960 = vmatpush3.msra.mxu1 %v992_v3  ;;  %2923 = vmatprep.subr.mxu0 %v975_v7  ;;  %v3185_v15 = vpop.eup %3184  ;;  %v863_v41 = vadd.f32 1.0, %v3183_v31 }
 0x116   : > { %1236 = vmatprep.mubr.f32.mxu0 %v878_v4  ;;  %2961 = vmatprep.subr.mxu1 %v1007_v2  ;;  %v3187_v34 = vpop.eup %3186  ;;  %v870_v46 = vadd.f32 1.0, %v3185_v15  ;;  %v877_v53 = vmul.f32 %v861_v28, %v749_v47 }
 0x117   : > { %1311 = vmatprep.mubr.f32.mxu1 %v880_v8  ;;  %2924 = vmatpush3.msra.mxu0 %v959_v9  ;;  %v3189_v40 = vpop.eup %3188  ;;  %v872_v29 = vadd.f32 1.0, %v3187_v34  ;;  %v879_v63 = vmul.f32 %v863_v41, %v751_v48  ;;  %v2775_v8 = vld [vmem:[%s4370_s8] ss:$0 sm:$0xff] }
 0x118   : > { %2962 = vmatpush3.msra.mxu1 %v991_v10  ;;  %2925 = vmatprep.subr.mxu0 %v974_v11  ;;  %v3191_v44 = vpop.eup %3190  ;;  %v869_v0 = vadd.f32 1.0, %v3189_v40  ;;  %v886_v54 = vmul.f32 %v870_v46, %v758_v51 }
 0x119   : > { %2963 = vmatprep.subr.mxu1 %v1006_v12  ;;  %2926 = vmatpush3.msra.mxu0 %v958_v16  ;;  %v871_v36 = vadd.f32 1.0, %v3191_v44  ;;  %v888_v55 = vmul.f32 %v872_v29, %v760_v52 }
 0x11a   : > { %2964 = vmatpush3.msra.mxu1 %v990_v17  ;;  %2927 = vmatprep.subr.mxu0 %v973_v20  ;;  %v885_v13 = vmul.f32 %v869_v0, %v757_v56 }
 0x11b   : > { %2965 = vmatprep.subr.mxu1 %v1005_v21  ;;  %2928 = vmatpush3.msra.mxu0 %v957_v23  ;;  %v887_v22 = vmul.f32 %v871_v36, %v759_v57  ;;  %v1341_v36 = vld [vmem:[%s4370_s8 + $0x18] sm:$0xff] }
 0x11c   : > { %2966 = vmatpush3.msra.mxu1 %v989_v24  ;;  %2929 = vmatprep.subr.mxu0 %v972_v26 }
 0x11d   : > { %2967 = vmatprep.subr.mxu1 %v1004_v27  ;;  %2930 = vmatpush3.msra.mxu0 %v956_v14 }
 0x11e   : > { %2968 = vmatpush3.msra.mxu1 %v988_v30  ;;  %2931 = vmatprep.subr.mxu0 %v971_v32 }
 0x11f   : > { %2969 = vmatprep.subr.mxu1 %v1003_v33  ;;  %2932 = vmatpush3.msra.mxu0 %v955_v18 }
 0x120   : > { %2970 = vmatpush3.msra.mxu1 %v987_v38  ;;  %2933 = vmatprep.subr.mxu0 %v970_v39 }
 0x121   : > { %2971 = vmatprep.subr.mxu1 %v1002_v19  ;;  %2934 = vmatpush3.msra.mxu0 %v954_v42 }
 0x122   : > { %2972 = vmatpush3.msra.mxu1 %v986_v43  ;;  %2935 = vmatprep.subr.mxu0 %v969_v45 }
 0x123   : > { %2973 = vmatprep.subr.mxu1 %v1001_v35  ;;  %2936 = vmatpush3.msra.mxu0 %v953_v49 }
 0x124   : > { %2974 = vmatpush3.msra.mxu1 %v985_v50  ;;  %1237 = vmatmul.mubr.f32.vlgmr.msra.gmra.mxu0 %v877_v53  ;;  %v1340_v50 = vld [vmem:[%s4370_s8 + $0x10] sm:$0xff] }
 0x125   : > { %1312 = vmatmul.mubr.f32.vlgmr.msra.gmra.mxu1 %v879_v63  ;;  %1241 = vmatprep.mubr.f32.mxu0 %v886_v54 }
 0x126   : > { %1316 = vmatprep.mubr.f32.mxu1 %v888_v55  ;;  %3040 = vmatprep.subr.mxu0 %v1347_v58 }
 0x127   : > { %3041 = vmatpush3.msra.mxu0 %v1347_v58 }
 0x128   : > { %1242 = vmatmul.mubr.f32.gmra.mxu0 %v885_v13  ;;  %3042 = vmatprep.subr.mxu0 %v1346_v59  ;;  %v2778_v13 = vld [vmem:[%s4370_s8 + $0xa] ss:$0 sm:$0xff] }
 0x129   : > { %1317 = vmatmul.mubr.f32.gmra.mxu1 %v887_v22  ;;  %3043 = vmatpush3.msra.mxu0 %v1346_v59  ;;  %v2783_v22 = vld [vmem:[%s4370_s8 + $0xb] ss:$0 sm:$0xff] }
 0x12a   : > { %3044 = vmatprep.subr.mxu0 %v1345_v5 }
 0x12b   : > { %3045 = vmatpush3.msra.mxu0 %v1345_v5 }
 0x12c   : > { %3046 = vmatprep.subr.mxu0 %v1344_v6 }
 0x12d   : > { %3047 = vmatpush3.msra.mxu0 %v1344_v6 }
 0x1c0   : > { %v2861_v60 = vpop.f32.mrf.mxu0 }
 0x1c2   : > { %v2862_v62 = vpop.f32.mrf.mxu0 }
 0x1c3   : > { %v2899_v61 = vpop.f32.mrf.mxu1  ;;  %v2863_v7 = vadd.f32 %v2862_v62, %v2861_v60  ;;  %v2794_v62 = vld [vmem:[%s4370_s8 + $0xc] ss:$0 sm:$0xff] }
 0x1c5   : > { %v2900_v1 = vpop.f32.mrf.mxu1  ;;  %v1089_v10 = vadd.f32 %v2863_v7, %v2775_v8 }
 0x1c6   : > { %v2901_v17 = vadd.f32 %v2900_v1, %v2899_v61 }
 0x1c7   : > { %v2864_v3 = vpop.f32.mrf.mxu0 }
 0x1c8   : > { %v2902_v4 = vpop.f32.mrf.mxu1  ;;  %v1164_v23 = vadd.f32 %v2901_v17, %v1089_v10 }
 0x1c9   : > { %v2865_v2 = vpop.f32.mrf.mxu0 }
 0x1ca   : > { %v2903_v9 = vpop.f32.mrf.mxu1  ;;  %v2866_v11 = vadd.f32 %v2865_v2, %v2864_v3 }
 0x1cb   : > { %v2904_v31 = vadd.f32 %v2903_v9, %v2902_v4 }
 0x1cc   : > { %v1094_v24 = vadd.f32 %v2866_v11, %v2775_v8 }
 0x1ce   : > { %v1169_v33 = vadd.f32 %v2904_v31, %v1094_v24 }
 0x1e4   : > { %v2937_v12 = vpop.f32.mrf.mxu0 }
 0x1e5   : > { %v2975_v16 = vpop.f32.mrf.mxu1 }
 0x1e6   : > { %v2938_v20 = vpop.f32.mrf.mxu0 }
 0x1e7   : > { %v2976_v21 = vpop.f32.mrf.mxu1  ;;  %v2939_v25 = vadd.f32 %v2938_v20, %v2937_v12 }
 0x1e8   : > { %v2940_v26 = vpop.f32.mrf.mxu0  ;;  %v2977_v30 = vadd.f32 %v2976_v21, %v2975_v16 }
 0x1e9   : > { %v2978_v27 = vpop.f32.mrf.mxu1  ;;  %v1239_v14 = vadd.f32 %v2939_v25, %v1164_v23 }
 0x1ea   : > { %v2941_v15 = vpop.f32.mrf.mxu0 }
 0x1eb   : > { %v2979_v32 = vpop.f32.mrf.mxu1  ;;  %v1314_v34 = vadd.f32 %v2977_v30, %v1239_v14  ;;  %v2942_v18 = vadd.f32 %v2941_v15, %v2940_v26 }
 0x1ec   : > { %v2980_v19 = vadd.f32 %v2979_v32, %v2978_v27 }
 0x1ed   : > { %v1324_v38 = vmul.f32 0.044715, %v1314_v34  ;;  %v1244_v39 = vadd.f32 %v2942_v18, %v1169_v33  ;;  %v1322_v48 = vmul.f32 0.5, %v1314_v34 }
 0x1ef   : > { %v1326_v40 = vmul.f32 %v1324_v38, %v1314_v34  ;;  %v1319_v28 = vadd.f32 %v2980_v19, %v1244_v39 }
 0x1f1   : > { %v1328_v41 = vmul.f32 %v1326_v40, %v1314_v34  ;;  %v1325_v42 = vmul.f32 0.044715, %v1319_v28  ;;  %v1323_v53 = vmul.f32 0.5, %v1319_v28 }
 0x1f3   : > { %v1330_v43 = vadd.f32 %v1328_v41, %v1314_v34  ;;  %v1327_v44 = vmul.f32 %v1325_v42, %v1319_v28 }
 0x1f5   : > { %v1329_v45 = vmul.f32 %v1327_v44, %v1319_v28  ;;  %v1332_v35 = vmul.f32 0.7978846, %v1330_v43 }
 0x1f7   : > { %v1331_v46 = vadd.f32 %v1329_v45, %v1319_v28  ;;  %3192 = vtanh.f32 %v1332_v35 }
 0x1f9   : > { %v1333_v29 = vmul.f32 0.7978846, %v1331_v46 }
 0x1fb   : > { %3194 = vtanh.f32 %v1333_v29 }
 0x204   : > { %v3193_v47 = vpop.eup %3192 }
 0x205   : > { %v1336_v49 = vadd.f32 1.0, %v3193_v47 }
 0x207   : > { %v4099_v51 = vmul.f32 %v1336_v49, %v1322_v48 }
 0x208   : > { %v3195_v52 = vpop.eup %3194 }
 0x209   : > { %v1337_v63 = vadd.f32 1.0, %v3195_v52  ;;  %v1342_v0 = vadd.f32 %v1340_v50, %v4099_v51 }
 0x20b   : > { %v4105_v54 = vmul.f32 %v1337_v63, %v1323_v53  ;;  %3048 = vmatprep.mubr.msk.f32.mxu0 %vm1348_vm2, %v1342_v0 }
 0x20d   : > { %v1343_v55 = vadd.f32 %v1341_v36, %v4105_v54 }
 0x20f   : > { %3049 = vmatmul.mubr.msk.f32.vlgmr.msra.gmra.mxu0 %vm1348_vm2, %v1343_v55 }
 0x2cf   : > { %v4110_v56 = vpop.f32.mrf.mxu0 }
 0x2d0   : > { %1441 = vrot.lane.b32.xlu0 %v4110_v56, %s3249_s13  ;;  %v1436_v60 = vmul.f32 %v4110_v56, %v2778_v13  ;;  %v1569_v61 = vmul.f32 %v4110_v56, %v2783_v22  ;;  %v1870_v3 = vmul.f32 %v4110_v56, %v2794_v62 }
 0x2d1   : > { %v4113_v57 = vpop.f32.mrf.mxu0 }
 0x2d2   : > { %v1435_v58 = vmul.f32 %v2778_v13, %v4113_v57  ;;  %v1568_v59 = vmul.f32 %v2783_v22, %v4113_v57  ;;  %v1869_v1 = vmul.f32 %v2794_v62, %v4113_v57 }
 0x2d4   : > { %1439 = vrot.lane.b32.xlu0 %v4113_v57, %s3249_s13  ;;  %3055 = vmatprep.mubr.msk.f32.mxu1 %vm1348_vm2, %v1435_v58 }
 0x2d5   : > { %3062 = vmatprep.mubr.msk.f32.mxu0 %vm1348_vm2, %v1568_v59 }
 0x342   : > { %v4126_v5 = vpop.permute.xlu0 %1441 }
 0x343   : > { %3051 = vmatprep.subr.msk.mxu1 %vm1348_vm2, %v4126_v5  ;;  %3058 = vmatprep.subr.msk.mxu0 %vm1348_vm2, %v4126_v5 }
 0x344   : > { %3052 = vmatpush3.xpose.msk.msra.mxu1 %vm1348_vm2, %v4126_v5  ;;  %3059 = vmatpush3.xpose.msk.msra.mxu0 %vm1348_vm2, %v4126_v5 }
 0x346   : > { %v4136_v6 = vpop.permute.xlu0 %1439 }
 0x347   : > { %3053 = vmatprep.subr.msk.mxu1 %vm1348_vm2, %v4136_v6  ;;  %3060 = vmatprep.subr.msk.mxu0 %vm1348_vm2, %v4136_v6 }
 0x348   : > { %3054 = vmatpush3.xpose.msk.msra.mxu1 %vm1348_vm2, %v4136_v6  ;;  %3061 = vmatpush3.xpose.msk.msra.mxu0 %vm1348_vm2, %v4136_v6 }
 0x349   : > { %3079 = vmatprep.subr.msk.mxu0 %vm1348_vm2, %v4126_v5 }
 0x34b   : > { %3056 = vmatmul.mubr.msk.f32.vlgmr.msra.gmra.mxu1 %vm1348_vm2, %v1436_v60  ;;  %3063 = vmatmul.mubr.msk.f32.vlgmr.msra.gmra.mxu0 %vm1348_vm2, %v1569_v61 }
 0x34c   : > { %3080 = vmatpush3.xpose.msk.msra.mxu0 %vm1348_vm2, %v4126_v5  ;;  %3083 = vmatprep.mubr.msk.f32.mxu0 %vm1348_vm2, %v1869_v1 }
 0x34d   : > { %3081 = vmatprep.subr.msk.mxu0 %vm1348_vm2, %v4136_v6 }
 0x350   : > { %3082 = vmatpush3.xpose.msk.msra.mxu0 %vm1348_vm2, %v4136_v6 }
 0x353   : > { %3084 = vmatmul.mubr.msk.f32.vlgmr.msra.gmra.mxu0 %vm1348_vm2, %v1870_v3 }
 0x40b   : > { %v3057_v4 = vpop.f32.mrf.mxu1  ;;  %v3064_v7 = vpop.f32.mrf.mxu0 }
 0x40c   : > { %v1652_v8 = vmul.f32 0.17677669, %v3064_v7  ;;  %v1529_v17 = vmul.f32 0.17677669, %v3057_v4 }
 0x40d   : > { %v1519_v2 = vpop.f32.mrf.mxu1  ;;  %v1642_v9 = vpop.f32.mrf.mxu0 }
 0x40e   : > { %v1528_v10 = vmul.f32 0.17677669, %v1519_v2  ;;  %v1651_v11 = vmul.f32 0.17677669, %v1642_v9  ;;  %v1656_v12 = vsel %vm1530_vm3, %v1652_v8, -inf  ;;  %v1534_v24 = vsel %vm1530_vm3, %v1529_v17, -inf }
 0x40f   : > { %1657 = vmax.xlane.f32.xlu1 %v1656_v12 }
 0x410   : > { %v1531_v16 = vsel %vm1530_vm3, %v1528_v10, -inf  ;;  %v1653_v20 = vsel %vm1530_vm3, %v1651_v11, -inf }
 0x411   : > { %1532 = vmax.xlane.f32.xlu0 %v1531_v16 }
 0x413   : > { %v3085_v21 = vpop.f32.mrf.mxu0  ;;  %1654 = vmax.xlane.f32.xlu1 %v1653_v20 }
 0x414   : > { %v1953_v23 = vmul.f32 0.17677669, %v3085_v21  ;;  %v2788_v21 = vld [vmem:[%s4366_s4 + $0x10] sm:$0xff] }
 0x415   : > { %v1943_v25 = vpop.f32.mrf.mxu0 }
 0x416   : > { %v1952_v26 = vmul.f32 0.17677669, %v1943_v25  ;;  %v1957_v27 = vsel %vm1530_vm3, %v1953_v23, -inf }
 0x417   : > { %1535 = vmax.xlane.f32.xlu1 %v1534_v24 }
 0x418   : > { %v1954_v31 = vsel %vm1530_vm3, %v1952_v26, -inf }
 0x41b   : > { %1958 = vmax.xlane.f32.xlu1 %v1957_v27 }
 0x41f   : > { %1955 = vmax.xlane.f32.xlu1 %v1954_v31 }
 0x427   : > { %1982 = vrot.lane.b32.xlu0 %v2794_v62, %s3250_s20 }
 0x430   : > { %1681 = vrot.lane.b32.xlu1 %v2783_v22, %s3250_s20 }
 0x434   : > { %1558 = vrot.lane.b32.xlu1 %v2778_v13, %s3250_s20 }
 0x498   : > { %v1658_v14 = vpop.xlane.xlu1 %1657 }
 0x499   : > { %v1660_v40 = vsub.f32 %v1652_v8, %v1658_v14 }
 0x49a   : > { %v1533_v44 = vpop.xlane.xlu0 %1532 }
 0x49b   : > { %v1663_v28 = vmul.f32 1.442695, %v1660_v40  ;;  %v1537_v45 = vsub.f32 %v1528_v10, %v1533_v44  ;;  %v2800_v44 = vld [vmem:[%s4366_s4 + $0x28] sm:$0xff] }
 0x49c   : > { %v1655_v30 = vpop.xlane.xlu1 %1654 }
 0x49d   : > { %3196 = vpow2.f32 %v1663_v28  ;;  %v1659_v42 = vsub.f32 %v1651_v11, %v1655_v30  ;;  %v1539_v29 = vmul.f32 1.442695, %v1537_v45  ;;  %v1553_v30 = vld [vmem:[%s4366_s4] sm:$0xff] }
 0x49e   : > { %v1983_v61 = vpop.permute.xlu0 %1982 }
 0x49f   : > { %v1661_v35 = vmul.f32 1.442695, %v1659_v42  ;;  %v1985_v62 = vmul.f32 %v1983_v61, %v4113_v57  ;;  %v1986_v3 = vmul.f32 %v4110_v56, %v1983_v61 }
 0x4a0   : > { %v1536_v15 = vpop.xlane.xlu1 %1535 }
 0x4a1   : > { %v1538_v41 = vsub.f32 %v1529_v17, %v1536_v15 }
 0x4a3   : > { %v1541_v43 = vmul.f32 1.442695, %v1538_v41  ;;  %v2799_v41 = vld [vmem:[%s4366_s4 + $0x20] sm:$0xff] }
 0x4a4   : > { %v1959_v32 = vpop.xlane.xlu1 %1958 }
 0x4a5   : > { %3198 = vpow2.f32 %v1541_v43  ;;  %v1961_v47 = vsub.f32 %v1953_v23, %v1959_v32 }
 0x4a6   : > { %3200 = vpow2.f32 %v1661_v35 }
 0x4a7   : > { %3202 = vpow2.f32 %v1539_v29  ;;  %v1964_v49 = vmul.f32 1.442695, %v1961_v47 }
 0x4a8   : > { %v1956_v33 = vpop.xlane.xlu1 %1955 }
 0x4a9   : > { %v1960_v50 = vsub.f32 %v1952_v26, %v1956_v33  ;;  %3204 = vpow2.f32 %v1964_v49  ;;  %v2789_v26 = vld [vmem:[%s4366_s4 + $0x18] sm:$0xff] }
 0x4aa   : > { %v3197_v46 = vpop.eup %3196 }
 0x4ab   : > { %v1668_v48 = vsel %vm1530_vm3, %v3197_v46, 0.0  ;;  %v1962_v52 = vmul.f32 1.442695, %v1960_v50 }
 0x4ac   : > { %v1682_v34 = vpop.permute.xlu1 %1681 }
 0x4ad   : > { %v1684_v18 = vmul.f32 %v1682_v34, %v4113_v57  ;;  %v1685_v38 = vmul.f32 %v4110_v56, %v1682_v34  ;;  %3206 = vpow2.f32 %v1962_v52  ;;  %v1554_v34 = vld [vmem:[%s4366_s4 + $0x8] sm:$0xff] }
 0x4af   : > { %1688 = vrot.lane.b32.xlu1 %v1684_v18, %s3250_s20  ;;  %1690 = vrot.lane.b32.xlu0 %v1685_v38, %s3250_s20 }
 0x4b0   : > { %v1559_v39 = vpop.permute.xlu1 %1558 }
 0x4b1   : > { %v1562_v19 = vmul.f32 %v4110_v56, %v1559_v39  ;;  %v1561_v58 = vmul.f32 %v1559_v39, %v4113_v57 }
 0x4b2   : > { %v3199_v53 = vpop.eup %3198 }
 0x4b3   : > { %1779 = vrot.lane.b32.xlu1 %v1562_v19, %s3250_s20  ;;  %v1546_v63 = vsel %vm1530_vm3, %v3199_v53, 0.0  ;;  %v3201_v0 = vpop.eup %3200 }
 0x4b4   : > { %v1665_v36 = vsel %vm1530_vm3, %v3201_v0, 0.0  ;;  %v3203_v55 = vpop.eup %3202 }
 0x4b5   : > { %v1543_v13 = vsel %vm1530_vm3, %v3203_v55, 0.0 }
 0x4b6   : > { %v4184_v22 = vpop.eup %3204 }
 0x4b7   : > { %v1969_v59 = vsel %vm1530_vm3, %v4184_v22, 0.0 }
 0x4ba   : > { %v4189_v60 = vpop.eup %3206 }
 0x4bb   : > { %v1966_v1 = vsel %vm1530_vm3, %v4189_v60, 0.0 }
 0x4ce   : > { %1669 = vadd.xlane.f32.xlu0 %v1668_v48 }
 0x4d7   : > { %1547 = vadd.xlane.f32.xlu1 %v1546_v63 }
 0x4db   : > { %1666 = vadd.xlane.f32.xlu1 %v1665_v36 }
 0x4df   : > { %1544 = vadd.xlane.f32.xlu1 %v1543_v13 }
 0x4e3   : > { %1970 = vadd.xlane.f32.xlu1 %v1969_v59 }
 0x4e4   : > { %1777 = vrot.lane.b32.xlu0 %v1561_v58, %s3250_s20 }
 0x4e7   : > { %1967 = vadd.xlane.f32.xlu1 %v1966_v1 }
 0x4e8   : > { %1989 = vrot.lane.b32.xlu0 %v1985_v62, %s3250_s20 }
 0x4f8   : > { %1991 = vrot.lane.b32.xlu1 %v1986_v3, %s3250_s20 }
 0x521   : > { %v1689_v4 = vpop.permute.xlu1 %1688  ;;  %v1691_v7 = vpop.permute.xlu0 %1690 }
 0x522   : > { %3065 = vmatprep.subr.mxu1 %v1691_v7 }
 0x523   : > { %3066 = vmatpush3.msra.mxu1 %v1691_v7 }
 0x524   : > { %3067 = vmatprep.subr.mxu1 %v1689_v4 }
 0x525   : > { %v1780_v8 = vpop.permute.xlu1 %1779  ;;  %3068 = vmatpush3.msra.mxu1 %v1689_v4 }
 0x526   : > { %3072 = vmatprep.subr.mxu1 %v1780_v8 }
 0x557   : > { %v1670_v2 = vpop.xlane.xlu0 %1669 }
 0x558   : > { %3208 = vrcp.f32 %v1670_v2 }
 0x55b   : > { %v1778_v32 = vpop.permute.xlu0 %1777 }
 0x55f   : > { %v1990_v40 = vpop.permute.xlu0 %1989 }
 0x560   : > { %v1548_v9 = vpop.xlane.xlu1 %1547 }
 0x564   : > { %v1667_v10 = vpop.xlane.xlu1 %1666 }
 0x565   : > { %3210 = vrcp.f32 %v1667_v10  ;;  %v3209_v16 = vpop.eup %3208 }
 0x566   : > { %3212 = vrcp.f32 %v1548_v9  ;;  %v1674_v23 = vmul.f32 %v3209_v16, %v3197_v46  ;;  %v2803_v46 = vld [vmem:[%s4370_s8 + $0xd] ss:$0 sm:$0xff] }
 0x567   : > { %v2083_v29 = vmul.f32 %v2803_v46, %v4113_v57  ;;  %v2084_v47 = vmul.f32 %v4110_v56, %v2803_v46 }
 0x568   : > { %v1545_v11 = vpop.xlane.xlu1 %1544  ;;  %v1679_v14 = vadd.f32 %v2789_v26, %v1674_v23 }
 0x569   : > { %3214 = vrcp.f32 %v1545_v11 }
 0x56c   : > { %v1971_v12 = vpop.xlane.xlu1 %1970 }
 0x56d   : > { %3216 = vrcp.f32 %v1971_v12 }
 0x570   : > { %v1968_v17 = vpop.xlane.xlu1 %1967 }
 0x571   : > { %3218 = vrcp.f32 %v1968_v17 }
 0x572   : > { %v3211_v20 = vpop.eup %3210 }
 0x573   : > { %v3213_v24 = vpop.eup %3212  ;;  %v1672_v25 = vmul.f32 %v3211_v20, %v3201_v0 }
 0x574   : > { %v1552_v15 = vmul.f32 %v3213_v24, %v3199_v53  ;;  %v1992_v19 = vpop.permute.xlu1 %1991 }
 0x575   : > { %v1678_v27 = vadd.f32 %v2788_v21, %v1672_v25  ;;  %v2808_v25 = vld [vmem:[%s4366_s4 + $0x30] sm:$0xff] }
 0x576   : > { %v3215_v31 = vpop.eup %3214  ;;  %v1556_v38 = vadd.f32 %v1554_v34, %v1552_v15 }
 0x577   : > { %3069 = vmatprep.mubr.msk.f32.mxu1 %vm1530_vm3, %v1678_v27  ;;  %v1550_v33 = vmul.f32 %v3215_v31, %v3203_v55  ;;  %v2809_v27 = vld [vmem:[%s4366_s4 + $0x38] sm:$0xff] }
 0x578   : > { %3070 = vmatmul.mubr.msk.f32.vlgmr.msra.gmra.mxu1 %vm1530_vm3, %v1679_v14 }
 0x579   : > { %3073 = vmatpush3.msra.mxu1 %v1780_v8  ;;  %v1555_v18 = vadd.f32 %v1553_v30, %v1550_v33 }
 0x57a   : > { %3074 = vmatprep.subr.mxu1 %v1778_v32  ;;  %v3217_v39 = vpop.eup %3216 }
 0x57b   : > { %3075 = vmatpush3.msra.mxu1 %v1778_v32  ;;  %3076 = vmatprep.mubr.msk.f32.mxu1 %vm1530_vm3, %v1555_v18  ;;  %v1975_v42 = vmul.f32 %v3217_v39, %v4184_v22 }
 0x57c   : > { %3086 = vmatprep.subr.mxu1 %v1992_v19  ;;  %3077 = vmatmul.mubr.msk.f32.vlgmr.msra.gmra.mxu1 %vm1530_vm3, %v1556_v38 }
 0x57d   : > { %3087 = vmatpush3.msra.mxu1 %v1992_v19  ;;  %v1980_v35 = vadd.f32 %v2800_v44, %v1975_v42 }
 0x57e   : > { %v3219_v28 = vpop.eup %3218  ;;  %3088 = vmatprep.subr.mxu1 %v1990_v40 }
 0x57f   : > { %3089 = vmatpush3.msra.mxu1 %v1990_v40  ;;  %v1973_v43 = vmul.f32 %v3219_v28, %v4189_v60 }
 0x580   : > { %3093 = vmatprep.subr.msk.mxu1 %vm1348_vm2, %v4126_v5 }
 0x581   : > { %v1979_v45 = vadd.f32 %v2799_v41, %v1973_v43 }
 0x583   : > { %3090 = vmatprep.mubr.msk.f32.mxu1 %vm1530_vm3, %v1979_v45 }
 0x584   : > { %3091 = vmatmul.mubr.msk.f32.vlgmr.msra.gmra.mxu1 %vm1530_vm3, %v1980_v35 }
 0x585   : > { %3094 = vmatpush3.xpose.msk.msra.mxu1 %vm1348_vm2, %v4126_v5  ;;  %3097 = vmatprep.mubr.msk.f32.mxu1 %vm1348_vm2, %v2083_v29 }
 0x586   : > { %3095 = vmatprep.subr.msk.mxu1 %vm1348_vm2, %v4136_v6 }
 0x589   : > { %3096 = vmatpush3.xpose.msk.msra.mxu1 %vm1348_vm2, %v4136_v6 }
 0x58c   : > { %3098 = vmatmul.mubr.msk.f32.vlgmr.msra.gmra.mxu1 %vm1348_vm2, %v2084_v47 }
 0x638   : > { %v3071_v48 = vpop.f32.mrf.mxu1 }
 0x63a   : > { %v1766_v49 = vpop.f32.mrf.mxu1 }
 0x63c   : > { %v3078_v50 = vpop.f32.mrf.mxu1 }
 0x63d   : > { %v1861_v52 = vadd.f32 %v3078_v50, %v3071_v48 }
 0x63e   : > { %v1855_v53 = vpop.f32.mrf.mxu1 }
 0x63f   : > { %v1856_v63 = vadd.f32 %v1855_v53, %v1766_v49 }
 0x644   : > { %v3092_v0 = vpop.f32.mrf.mxu1 }
 0x645   : > { %v2077_v5 = vadd.f32 %v3092_v0, %v1861_v52  ;;  %v2812_v52 = vld [vmem:[%s4370_s8 + $0x1] ss:$0 sm:$0xff] }
 0x646   : > { %v2067_v36 = vpop.f32.mrf.mxu1 }
 0x647   : > { %v2076_v55 = vadd.f32 %v2067_v36, %v1856_v63  ;;  %v2813_v63 = vld [vmem:[%s4370_s8 + $0x2] ss:$0 sm:$0xff] }
 0x64c   : > { %v3099_v13 = vpop.f32.mrf.mxu1 }
 0x64d   : > { %v2167_v22 = vmul.f32 0.17677669, %v3099_v13 }
 0x64e   : > { %v2157_v58 = vpop.f32.mrf.mxu1 }
 0x64f   : > { %v2166_v59 = vmul.f32 0.17677669, %v2157_v58  ;;  %v2171_v6 = vsel %vm1530_vm3, %v2167_v22, -inf }
 0x650   : > { %2172 = vmax.xlane.f32.xlu0 %v2171_v6 }
 0x651   : > { %v2168_v60 = vsel %vm1530_vm3, %v2166_v59, -inf }
 0x652   : > { %2169 = vmax.xlane.f32.xlu1 %v2168_v60 }
 0x666   : > { %2196 = vrot.lane.b32.xlu0 %v2803_v46, %s3250_s20 }
 0x6d9   : > { %v2173_v61 = vpop.xlane.xlu0 %2172 }
 0x6da   : > { %v2175_v62 = vsub.f32 %v2167_v22, %v2173_v61 }
 0x6db   : > { %v2170_v1 = vpop.xlane.xlu1 %2169 }
 0x6dc   : > { %v2178_v3 = vmul.f32 1.442695, %v2175_v62  ;;  %v2174_v4 = vsub.f32 %v2166_v59, %v2170_v1 }
 0x6dd   : > { %v2197_v7 = vpop.permute.xlu0 %2196 }
 0x6de   : > { %3220 = vpow2.f32 %v2178_v3  ;;  %v2176_v8 = vmul.f32 1.442695, %v2174_v4  ;;  %v2199_v2 = vmul.f32 %v2197_v7, %v4113_v57  ;;  %v2200_v16 = vmul.f32 %v4110_v56, %v2197_v7 }
 0x6e0   : > { %3222 = vpow2.f32 %v2176_v8  ;;  %2203 = vrot.lane.b32.xlu0 %v2199_v2, %s3250_s20 }
 0x6eb   : > { %v3221_v9 = vpop.eup %3220 }
 0x6ec   : > { %v2183_v10 = vsel %vm1530_vm3, %v3221_v9, 0.0 }
 0x6ed   : > { %v3223_v11 = vpop.eup %3222  ;;  %2184 = vadd.xlane.f32.xlu1 %v2183_v10  ;;  %v2377_v10 = vld [vmem:[%s4367_s5 + $0x10] sm:$0xff] }
 0x6ee   : > { %v2180_v12 = vsel %vm1530_vm3, %v3223_v11, 0.0 }
 0x6f1   : > { %2181 = vadd.xlane.f32.xlu1 %v2180_v12  ;;  %v2375_v12 = vld [vmem:[%s4367_s5] sm:$0xff] }
 0x702   : > { %2205 = vrot.lane.b32.xlu1 %v2200_v16, %s3250_s20  ;;  %v2474_v16 = vld [vmem:[%s4368_s6 + $0x38] sm:$0xff] }
 0x703   : > { %3118 = vmatprep.subr.mxu1 %v2474_v16 }
 0x704   : > { %3119 = vmatpush3.msra.mxu1 %v2474_v16 }
 0x752   : > { %v2204_v21 = vpop.permute.xlu0 %2203 }
 0x776   : > { %v2185_v17 = vpop.xlane.xlu1 %2184 }
 0x777   : > { %3224 = vrcp.f32 %v2185_v17  ;;  %v2473_v17 = vld [vmem:[%s4368_s6 + $0x30] sm:$0xff] }
 0x778   : > { %3120 = vmatprep.subr.mxu1 %v2473_v17 }
 0x779   : > { %3121 = vmatpush3.msra.mxu1 %v2473_v17 }
 0x77a   : > { %v2182_v20 = vpop.xlane.xlu1 %2181 }
 0x77b   : > { %3226 = vrcp.f32 %v2182_v20  ;;  %v2472_v20 = vld [vmem:[%s4368_s6 + $0x28] sm:$0xff] }
 0x77c   : > { %3122 = vmatprep.subr.mxu1 %v2472_v20 }
 0x77d   : > { %3123 = vmatpush3.msra.mxu1 %v2472_v20 }
 0x77e   : > { %v2206_v57 = vpop.permute.xlu1 %2205 }
 0x77f   : > { %3100 = vmatprep.subr.mxu0 %v2206_v57 }
 0x780   : > { %3101 = vmatpush3.msra.mxu0 %v2206_v57  ;;  %v2471_v57 = vld [vmem:[%s4368_s6 + $0x20] sm:$0xff] }
 0x781   : > { %3102 = vmatprep.subr.mxu0 %v2204_v21  ;;  %3124 = vmatprep.subr.mxu1 %v2471_v57 }
 0x782   : > { %3103 = vmatpush3.msra.mxu0 %v2204_v21  ;;  %3125 = vmatpush3.msra.mxu1 %v2471_v57 }
 0x784   : > { %v3225_v23 = vpop.eup %3224 }
 0x785   : > { %v2189_v26 = vmul.f32 %v3225_v23, %v3221_v9 }
 0x787   : > { %v2194_v14 = vadd.f32 %v2809_v27, %v2189_v26 }
 0x788   : > { %v3227_v24 = vpop.eup %3226 }
 0x789   : > { %v2187_v56 = vmul.f32 %v3227_v24, %v3223_v11  ;;  %v2376_v11 = vld [vmem:[%s4367_s5 + $0x8] sm:$0xff] }
 0x78b   : > { %v2193_v31 = vadd.f32 %v2808_v25, %v2187_v56 }
 0x78d   : > { %3104 = vmatprep.mubr.msk.f32.mxu0 %vm1530_vm3, %v2193_v31  ;;  %v2814_v31 = vld [vmem:[%s4370_s8 + $0x3] ss:$0 sm:$0xff] }
 0x78e   : > { %3105 = vmatmul.mubr.msk.f32.vlgmr.msra.gmra.mxu0 %vm1530_vm3, %v2194_v14 }
 0x84e   : > { %v3106_v30 = vpop.f32.mrf.mxu0 }
 0x84f   : > { %v2291_v15 = vadd.f32 %v3106_v30, %v2077_v5  ;;  %v2815_v30 = vld [vmem:[%s4370_s8 + $0x4] ss:$0 sm:$0xff] }
 0x850   : > { %v2281_v32 = vpop.f32.mrf.mxu0 }
 0x851   : > { %v2290_v33 = vadd.f32 %v2281_v32, %v2076_v55  ;;  %v2297_v34 = vsel %vm1348_vm2, %v2291_v15, 0.0 }
 0x852   : > { %2298 = vadd.xlane.f32.xlu1 %v2297_v34 }
 0x853   : > { %v2294_v18 = vsel %vm1348_vm2, %v2290_v33, 0.0 }
 0x854   : > { %2295 = vadd.xlane.f32.xlu0 %v2294_v18 }
 0x8db   : > { %v2299_v38 = vpop.xlane.xlu1 %2298 }
 0x8dc   : > { %v2302_v39 = vmul.f32 0.03125, %v2299_v38 }
 0x8dd   : > { %v2296_v19 = vpop.xlane.xlu0 %2295 }
 0x8de   : > { %v2301_v40 = vmul.f32 0.03125, %v2296_v19  ;;  %v2304_v28 = vsub.f32 %v2291_v15, %v2302_v39  ;;  %v2470_v39 = vld [vmem:[%s4368_s6 + $0x18] sm:$0xff]  ;;  %v2469_v19 = vld [vmem:[%s4368_s6 + $0x10] sm:$0xff] }
 0x8df   : > { %3126 = vmatprep.subr.mxu1 %v2470_v39 }
 0x8e0   : > { %v2303_v41 = vsub.f32 %v2290_v33, %v2301_v40  ;;  %v2306_v44 = vmul.f32 %v2304_v28, %v2304_v28  ;;  %3127 = vmatpush3.msra.mxu1 %v2470_v39  ;;  %v2468_v40 = vld [vmem:[%s4368_s6 + $0x8] sm:$0xff] }
 0x8e1   : > { %3128 = vmatprep.subr.mxu1 %v2469_v19 }
 0x8e2   : > { %v2305_v42 = vmul.f32 %v2303_v41, %v2303_v41  ;;  %v2310_v45 = vsel %vm1348_vm2, %v2306_v44, 0.0  ;;  %3129 = vmatpush3.msra.mxu1 %v2469_v19 }
 0x8e3   : > { %3130 = vmatprep.subr.mxu1 %v2468_v40 }
 0x8e4   : > { %v2307_v43 = vsel %vm1348_vm2, %v2305_v42, 0.0  ;;  %3131 = vmatpush3.msra.mxu1 %v2468_v40 }
 0x8e5   : > { %2308 = vadd.xlane.f32.xlu0 %v2307_v43 }
 0x8e9   : > { %2311 = vadd.xlane.f32.xlu0 %v2310_v45 }
 0x96e   : > { %v2309_v35 = vpop.xlane.xlu0 %2308 }
 0x96f   : > { %v2313_v46 = vmul.f32 0.03125, %v2309_v35 }
 0x971   : > { %v2315_v29 = vadd.f32 1e-05, %v2313_v46 }
 0x972   : > { %v2312_v47 = vpop.xlane.xlu0 %2311 }
 0x973   : > { %3228 = vrsqrt.f32 %v2315_v29  ;;  %v2314_v48 = vmul.f32 0.03125, %v2312_v47  ;;  %v2819_v29 = vld [vmem:[%s4370_s8 + $0x8] ss:$0 sm:$0xff] }
 0x975   : > { %v2316_v49 = vadd.f32 1e-05, %v2314_v48 }
 0x977   : > { %3230 = vrsqrt.f32 %v2316_v49 }
 0x980   : > { %v3229_v50 = vpop.eup %3228 }
 0x981   : > { %v2319_v53 = vmul.f32 %v3229_v50, %v2303_v41  ;;  %v2816_v41 = vld [vmem:[%s4370_s8 + $0x7] ss:$0 sm:$0xff] }
 0x983   : > { %v2325_v0 = vmul.f32 %v2812_v52, %v2319_v53 }
 0x984   : > { %v3231_v5 = vpop.eup %3230 }
 0x985   : > { %v2331_v36 = vadd.f32 %v2813_v63, %v2325_v0  ;;  %v2320_v55 = vmul.f32 %v3231_v5, %v2304_v28  ;;  %v2467_v28 = vld [vmem:[%s4368_s6] sm:$0xff] }
 0x986   : > { %3132 = vmatprep.subr.mxu1 %v2467_v28 }
 0x987   : > { %v2333_v13 = vadd.f32 %v2331_v36, %v4099_v51  ;;  %v2326_v22 = vmul.f32 %v2812_v52, %v2320_v55  ;;  %3133 = vmatpush3.msra.mxu1 %v2467_v28 }
 0x989   : > { %v2337_v58 = vsel %vm1348_vm2, %v2333_v13, 0.0  ;;  %v2332_v59 = vadd.f32 %v2813_v63, %v2326_v22 }
 0x98a   : > { %2338 = vadd.xlane.f32.xlu1 %v2337_v58 }
 0x98b   : > { %v2334_v6 = vadd.f32 %v2332_v59, %v4105_v54  ;;  %v2378_v54 = vld [vmem:[%s4367_s5 + $0x18] sm:$0xff] }
 0x98c   : > { %3107 = vmatprep.subr.mxu0 %v2378_v54 }
 0x98d   : > { %v2340_v60 = vsel %vm1348_vm2, %v2334_v6, 0.0  ;;  %3108 = vmatpush3.msra.mxu0 %v2378_v54 }
 0x98e   : > { %2341 = vadd.xlane.f32.xlu0 %v2340_v60  ;;  %3109 = vmatprep.subr.mxu0 %v2377_v10 }
 0x98f   : > { %3110 = vmatpush3.msra.mxu0 %v2377_v10 }
 0x990   : > { %3111 = vmatprep.subr.mxu0 %v2376_v11 }
 0x991   : > { %3112 = vmatpush3.msra.mxu0 %v2376_v11  ;;  %v2822_v11 = vld [vmem:[%s4370_s8 + $0x5] ss:$0 sm:$0xff] }
 0x992   : > { %3113 = vmatprep.subr.mxu0 %v2375_v12 }
 0x993   : > { %3114 = vmatpush3.msra.mxu0 %v2375_v12 }
 0x994   : > { %3137 = vmatprep.subr.mxu0 %v3248_v37 }
 0xa13   : > { %v2339_v61 = vpop.xlane.xlu1 %2338 }
 0xa14   : > { %v2343_v62 = vmul.f32 0.03125, %v2339_v61 }
 0xa16   : > { %v2345_v1 = vsub.f32 %v2333_v13, %v2343_v62  ;;  %v2618_v62 = vld [vmem:[%s4369_s7 + $0x18] sm:$0xff] }
 0xa17   : > { %v2342_v3 = vpop.xlane.xlu0 %2341 }
 0xa18   : > { %v2344_v4 = vmul.f32 0.03125, %v2342_v3  ;;  %v2347_v7 = vmul.f32 %v2345_v1, %v2345_v1  ;;  %v2616_v3 = vld [vmem:[%s4369_s7 + $0x8] sm:$0xff] }
 0xa1a   : > { %v2346_v8 = vsub.f32 %v2334_v6, %v2344_v4  ;;  %v2349_v2 = vsel %vm1348_vm2, %v2347_v7, 0.0  ;;  %v2615_v4 = vld [vmem:[%s4369_s7] sm:$0xff] }
 0xa1b   : > { %2350 = vadd.xlane.f32.xlu1 %v2349_v2 }
 0xa1c   : > { %v2348_v51 = vmul.f32 %v2346_v8, %v2346_v8 }
 0xa1e   : > { %v2352_v9 = vsel %vm1348_vm2, %v2348_v51, 0.0 }
 0xa1f   : > { %2353 = vadd.xlane.f32.xlu0 %v2352_v9 }
 0xaa4   : > { %v2351_v21 = vpop.xlane.xlu1 %2350 }
 0xaa5   : > { %v2355_v23 = vmul.f32 0.03125, %v2351_v21 }
 0xaa7   : > { %v2357_v24 = vadd.f32 1e-05, %v2355_v23 }
 0xaa8   : > { %v2354_v25 = vpop.xlane.xlu0 %2353 }
 0xaa9   : > { %3232 = vrsqrt.f32 %v2357_v24  ;;  %v2356_v26 = vmul.f32 0.03125, %v2354_v25 }
 0xaab   : > { %v2358_v56 = vadd.f32 1e-05, %v2356_v26 }
 0xaad   : > { %3234 = vrsqrt.f32 %v2358_v56 }
 0xab6   : > { %v3233_v27 = vpop.eup %3232 }
 0xab7   : > { %v2361_v14 = vmul.f32 %v3233_v27, %v2345_v1  ;;  %v2617_v1 = vld [vmem:[%s4369_s7 + $0x10] sm:$0xff] }
 0xab9   : > { %v2367_v15 = vmul.f32 %v2814_v31, %v2361_v14 }
 0xaba   : > { %v3235_v32 = vpop.eup %3234 }
 0xabb   : > { %v2362_v33 = vmul.f32 %v3235_v32, %v2346_v8  ;;  %v2373_v34 = vadd.f32 %v2815_v30, %v2367_v15 }
 0xabd   : > { %v2368_v18 = vmul.f32 %v2814_v31, %v2362_v33  ;;  %3115 = vmatprep.mubr.msk.f32.mxu0 %vm1348_vm2, %v2373_v34  ;;  %v2824_v33 = vld [vmem:[%s4370_s8 + $0x9] ss:$0 sm:$0xff] }
 0xabf   : > { %v2374_v38 = vadd.f32 %v2815_v30, %v2368_v18 }
 0xac1   : > { %3116 = vmatmul.mubr.msk.f32.vlgmr.msra.gmra.mxu0 %vm1348_vm2, %v2374_v38 }
 0xac2   : > { %3138 = vmatpush3.msra.mxu0 %v2618_v62  ;;  %3145 = vmatprep.mubr.msk.f32.mxu0 %vm3251_vm5, %v3248_v37 }
 0xac3   : > { %3139 = vmatprep.subr.mxu0 %v3248_v37 }
 0xac4   : > { %3140 = vmatpush3.msra.mxu0 %v2617_v1 }
 0xac5   : > { %3141 = vmatprep.subr.mxu0 %v3248_v37 }
 0xac6   : > { %3142 = vmatpush3.msra.mxu0 %v2616_v3 }
 0xac7   : > { %3143 = vmatprep.subr.mxu0 %v3248_v37  ;;  %v2823_v37 = vld [vmem:[%s4370_s8 + $0x6] ss:$0 sm:$0xff] }
 0xac8   : > { %3144 = vmatpush3.msra.mxu0 %v2615_v4 }
 0xb81   : > { %v3117_v42 = vpop.f32.mrf.mxu0 }
 0xb82   : > { %v2462_v43 = vadd.f32 %v3117_v42, %v2816_v41 }
 0xb83   : > { %v2456_v44 = vpop.f32.mrf.mxu0 }
 0xb84   : > { %v2457_v45 = vadd.f32 %v2816_v41, %v2456_v44  ;;  %v2466_v46 = vmax.f32 %v2462_v43, 0.0 }
 0xb86   : > { %v2465_v35 = vmax.f32 %v2457_v45, 0.0 }
 0xb88   : > { %3134 = vmatprep.mubr.msk.f32.mxu1 %vm2480_vm4, %v2465_v35 }
 0xb89   : > { %3135 = vmatmul.mubr.msk.f32.vlgmr.msra.gmra.mxu1 %vm2480_vm4, %v2466_v46 }
 0xc49   : > { %v3136_v47 = vpop.f32.mrf.mxu1 }
 0xc4a   : > { %v2559_v48 = vadd.f32 %v3136_v47, %v2819_v29 }
 0xc4b   : > { %v2553_v49 = vpop.f32.mrf.mxu1 }
 0xc4c   : > { %v2554_v50 = vadd.f32 %v2819_v29, %v2553_v49  ;;  %v2563_v52 = vadd.f32 %v2559_v48, %v2374_v38 }
 0xc4e   : > { %v2569_v53 = vsel %vm1348_vm2, %v2563_v52, 0.0  ;;  %v2562_v63 = vadd.f32 %v2554_v50, %v2373_v34 }
 0xc4f   : > { %2570 = vadd.xlane.f32.xlu0 %v2569_v53 }
 0xc50   : > { %v2566_v0 = vsel %vm1348_vm2, %v2562_v63, 0.0 }
 0xc51   : > { %2567 = vadd.xlane.f32.xlu1 %v2566_v0 }
 0xcd8   : > { %v2571_v5 = vpop.xlane.xlu0 %2570 }
 0xcd9   : > { %v2573_v36 = vmul.f32 0.03125, %v2571_v5 }
 0xcda   : > { %v2568_v55 = vpop.xlane.xlu1 %2567 }
 0xcdb   : > { %v2575_v13 = vsub.f32 %v2563_v52, %v2573_v36  ;;  %v2572_v22 = vmul.f32 0.03125, %v2568_v55 }
 0xcdd   : > { %v2574_v58 = vsub.f32 %v2562_v63, %v2572_v22  ;;  %v2577_v59 = vmul.f32 %v2575_v13, %v2575_v13 }
 0xcdf   : > { %v2581_v6 = vsel %vm1348_vm2, %v2577_v59, 0.0  ;;  %v2576_v60 = vmul.f32 %v2574_v58, %v2574_v58 }
 0xce0   : > { %2582 = vadd.xlane.f32.xlu0 %v2581_v6 }
 0xce1   : > { %v2578_v61 = vsel %vm1348_vm2, %v2576_v60, 0.0 }
 0xce2   : > { %2579 = vadd.xlane.f32.xlu1 %v2578_v61 }
 0xd69   : > { %v2583_v7 = vpop.xlane.xlu0 %2582 }
 0xd6a   : > { %v2585_v8 = vmul.f32 0.03125, %v2583_v7 }
 0xd6b   : > { %v2580_v2 = vpop.xlane.xlu1 %2579 }
 0xd6c   : > { %v2587_v51 = vadd.f32 1e-05, %v2585_v8  ;;  %v2584_v9 = vmul.f32 0.03125, %v2580_v2 }
 0xd6e   : > { %3236 = vrsqrt.f32 %v2587_v51  ;;  %v2586_v54 = vadd.f32 1e-05, %v2584_v9 }
 0xd70   : > { %3238 = vrsqrt.f32 %v2586_v54 }
 0xd7b   : > { %v3237_v10 = vpop.eup %3236 }
 0xd7c   : > { %v2591_v12 = vmul.f32 %v3237_v10, %v2575_v13 }
 0xd7d   : > { %v3239_v16 = vpop.eup %3238 }
 0xd7e   : > { %v2597_v17 = vmul.f32 %v2822_v11, %v2591_v12  ;;  %v2590_v20 = vmul.f32 %v3239_v16, %v2574_v58 }
 0xd80   : > { %v2603_v57 = vadd.f32 %v2823_v37, %v2597_v17  ;;  %v2596_v21 = vmul.f32 %v2822_v11, %v2590_v20 }
 0xd82   : > { %v2602_v23 = vadd.f32 %v2823_v37, %v2596_v21  ;;  %v2605_v25 = vsel %vm1348_vm2, %v2603_v57, 0.0 }
 0xd84   : > { %v2604_v24 = vsel %vm1348_vm2, %v2602_v23, 0.0 }
 0xd85   : > { %v2606_v26 = vadd.f32 %v2605_v25, %v2604_v24 }
 0xd87   : > { %v2607_v56 = vrot.slane %v2606_v26, 4 }
 0xd89   : > { %v2608_v27 = vadd.f32 %v2607_v56, %v2606_v26 }
 0xd8b   : > { %v2609_v31 = vrot.slane %v2608_v27, 2 }
 0xd8d   : > { %v2610_v14 = vadd.f32 %v2609_v31, %v2608_v27 }
 0xd8f   : > { %v2611_v30 = vrot.slane %v2610_v14, 1 }
 0xd91   : > { %v2612_v15 = vadd.f32 %v2611_v30, %v2610_v14 }
 0xd93   : > { %v2614_v32 = vmul.f32 0.0625, %v2612_v15 }
 0xd95   : > { %3146 = vmatmul.mubr.msk.f32.vlgmr.msra.gmra.mxu0 %vm1348_vm2, %v2614_v32 }
 0xe55   : > { %v2693_v34 = vpop.f32.mrf.mxu0 }
 0xe56   : > { %v2694_v18 = vadd.f32 %v2824_v33, %v2693_v34 }
 0xe57   : > { %v3147_v38 = vpop.f32.mrf.mxu0 }
 0xe58   : > { %2697 = vst [vmem:[%s330_s26] sm:$0xff] %v2694_v18 }
 0xe59 PF: > { %s19_s30 = sadd.s32 1, %s3246_s30  }
 0xe5a   : > { %p16_p4 = scmp.ge.s32.totalorder %s19_s30, 4  }
 0xe5c   :  { %18 = sbr.rel (!%p16_p4) target bundleno = 1 (0x1), region = 89 }

</bundles_post_ra>
